<compile_context>
chip_gen: v5e
topology: v5e:2x2
jax: 0.10.0
libtpu: 0.0.40
codegen_flags: <defaults>
</compile_context>

<pallas_src>
import functools

import jax
import jax.numpy as jnp
from jax.experimental import pallas as pl
from jax.experimental.pallas import tpu as pltpu

INPUT_DIM = 16
HIDDEN = 32          # hidden_dim (small-shape pick; module default is 128)
NUM_HEADS = 4        # unused at runtime: seq_len==1 makes attention head-agnostic
NUM_LAYERS = 3
FFN = HIDDEN * 4     # dim_feedforward = 128
OUT_HIDDEN = HIDDEN // 2
EPS = 1e-5           # nn.LayerNorm default eps
BATCH = 8
LANES = 128


def _round_up(n, m):
    return ((n + m - 1) // m) * m


# ---- packed-slab row layouts ------------------------------------------------
# wp    : (32, 16)   bf16   input projection W
# wm32  : (496, 32)  bf16   [Wvo=Wo@Wv (3*32) | W1 (3*128) | Wa (16)]
# wm128 : (96, 128)  bf16   [W2 (3*32)]
# vecs  : (1032, 1)  f32    column vectors: bp | per-layer {bvo,g1,be1,b1,b2,g2,be2} | ba | wb | bb
_W1_OFF = NUM_LAYERS * HIDDEN                              # 96
_WA_OFF = _W1_OFF + NUM_LAYERS * FFN                       # 480
_WM32_ROWS = _WA_OFF + OUT_HIDDEN                          # 496
_WM128_ROWS = NUM_LAYERS * HIDDEN                          # 96

_VEC_LAYER_BASE = HIDDEN                                   # 32  (after bp)
_VEC_PER_LAYER = 6 * HIDDEN + FFN                          # 320
_VEC_BA = _VEC_LAYER_BASE + NUM_LAYERS * _VEC_PER_LAYER    # 992
_VEC_WB = _VEC_BA + OUT_HIDDEN                             # 1008
_VEC_BB = _VEC_WB + OUT_HIDDEN                             # 1024
_VEC_ROWS = _round_up(_VEC_BB + 1, 8)                      # 1032


def _layernorm_t(x, gamma, beta):
    """LayerNorm over the feature (sublane) axis of a (D, TB) activation."""
    mu = jnp.mean(x, axis=0, keepdims=True)                       # (1, TB)
    var = jnp.mean(x * x, axis=0, keepdims=True) - mu * mu        # biased var
    return (x - mu) * jax.lax.rsqrt(var + EPS) * gamma + beta


def chem_transformer_kernel(x_ref, wp_ref, wm32_ref, wm128_ref, vec_ref, o_ref):
    f32, bf16 = jnp.float32, jnp.bfloat16

    def col(off, d):
        return vec_ref[off:off + d, :]                            # (d, 1) f32 column

    # input projection: h^T = Wp @ x^T + bp       -> (32, TB) f32
    h = jnp.dot(wp_ref[...], x_ref[...], preferred_element_type=f32) + col(0, HIDDEN)

    # TransformerEncoder (post-norm, relu, dropout == identity)
    for l in range(NUM_LAYERS):
        wvo = wm32_ref[l * HIDDEN:(l + 1) * HIDDEN, :]                  # (32, 32)
        w1 = wm32_ref[_W1_OFF + l * FFN:_W1_OFF + (l + 1) * FFN, :]     # (128, 32)
        w2 = wm128_ref[l * HIDDEN:(l + 1) * HIDDEN, :]                  # (32, 128)

        vb = _VEC_LAYER_BASE + l * _VEC_PER_LAYER
        bvo = col(vb, HIDDEN)
        g1, be1 = col(vb + 32, HIDDEN), col(vb + 64, HIDDEN)
        b1 = col(vb + 96, FFN)
        b2 = col(vb + 224, HIDDEN)
        g2, be2 = col(vb + 256, HIDDEN), col(vb + 288, HIDDEN)

        # self-attention (seq_len==1): out_proj(V_proj(h)) == (Wo Wv) h^T + (Wo bv + bo)
        sa = jnp.dot(wvo, h.astype(bf16), preferred_element_type=f32) + bvo
        h = _layernorm_t(h + sa, g1, be1)

        # feed-forward: linear1 -> relu -> linear2
        ff = jnp.maximum(jnp.dot(w1, h.astype(bf16), preferred_element_type=f32) + b1, 0.0)
        ff = jnp.dot(w2, ff.astype(bf16), preferred_element_type=f32) + b2
        h = _layernorm_t(h + ff, g2, be2)

    # output head: Linear(32->16) -> ReLU -> Linear(16->1)
    wa = wm32_ref[_WA_OFF:_WA_OFF + OUT_HIDDEN, :]                      # (16, 32)
    ba = col(_VEC_BA, OUT_HIDDEN)                                       # (16, 1)
    wb = col(_VEC_WB, OUT_HIDDEN)                                       # (16, 1)
    bb = col(_VEC_BB, 1)                                                # (1, 1)

    y = jnp.maximum(jnp.dot(wa, h.astype(bf16), preferred_element_type=f32) + ba, 0.0)  # (16, TB)
    # width-1 linear as a 16-sublane reduce -> lane-dense (1, TB) row
    row = jnp.sum(y * wb, axis=0, keepdims=True) + bb                   # (1, TB)
    # store as a full (8, TB) block -> dense vector stores, no masked vst
    o_ref[...] = jnp.broadcast_to(row, o_ref.shape)


# ----------------------------------------------------------------------------
# Parameter construction & one-time host-side packing
# ----------------------------------------------------------------------------
def init_params(key):
    """Deterministic synthetic parameters, shaped like the PyTorch module."""
    ks = iter(jax.random.split(key, 64))

    def lin(out_d, in_d):
        w = jax.random.normal(next(ks), (out_d, in_d), jnp.float32) / jnp.sqrt(in_d)
        b = jax.random.normal(next(ks), (out_d,), jnp.float32) * 0.02
        return w, b

    p = {}
    p["wp"], p["bp"] = lin(HIDDEN, INPUT_DIM)

    wv, bv, wo, bo, g1, be1, w1, bf1, w2, bf2, g2, be2 = ([] for _ in range(12))
    for _ in range(NUM_LAYERS):
        # full in_proj (3D x D) as in nn.MultiheadAttention; only the V slice is live
        in_proj_w, in_proj_b = lin(3 * HIDDEN, HIDDEN)
        wv.append(in_proj_w[2 * HIDDEN:3 * HIDDEN])
        bv.append(in_proj_b[2 * HIDDEN:3 * HIDDEN])
        w, b = lin(HIDDEN, HIDDEN); wo.append(w); bo.append(b)
        g1.append(jnp.ones((HIDDEN,), jnp.float32)); be1.append(jnp.zeros((HIDDEN,), jnp.float32))
        w, b = lin(FFN, HIDDEN); w1.append(w); bf1.append(b)
        w, b = lin(HIDDEN, FFN); w2.append(w); bf2.append(b)
        g2.append(jnp.ones((HIDDEN,), jnp.float32)); be2.append(jnp.zeros((HIDDEN,), jnp.float32))

    stack = lambda xs: jnp.stack(xs, axis=0)
    p.update(wv=stack(wv), bv=stack(bv), wo=stack(wo), bo=stack(bo),
             g1=stack(g1), be1=stack(be1), w1=stack(w1), bf1=stack(bf1),
             w2=stack(w2), bf2=stack(bf2), g2=stack(g2), be2=stack(be2))

    p["wa"], p["ba"] = lin(OUT_HIDDEN, HIDDEN)
    p["wb"], p["bb"] = lin(1, OUT_HIDDEN)
    return p


def prepare_params(p):
    """One-time packing: fuse Wo@Wv, pack weights as bf16 slabs, biases as f32 columns."""
    bf16 = jnp.bfloat16
    wp = p["wp"].astype(bf16)                                          # (32, 16)

    wvo_list, w1_list, w2_list = [], [], []
    vec_cols = [p["bp"].reshape(-1, 1)]
    for l in range(NUM_LAYERS):
        # column layout:  sa^T = (Wo Wv) h^T + (Wo bv + bo)
        wvo_list.append((p["wo"][l] @ p["wv"][l]).astype(bf16))        # (32, 32)
        bvo = p["wo"][l] @ p["bv"][l] + p["bo"][l]                     # (32,)
        w1_list.append(p["w1"][l].astype(bf16))                        # (128, 32)
        w2_list.append(p["w2"][l].astype(bf16))                        # (32, 128)
        for v in (bvo, p["g1"][l], p["be1"][l], p["bf1"][l],
                  p["bf2"][l], p["g2"][l], p["be2"][l]):
            vec_cols.append(v.reshape(-1, 1))
    wa = p["wa"].astype(bf16)                                          # (16, 32)
    vec_cols += [p["ba"].reshape(-1, 1), p["wb"][0].reshape(-1, 1),
                 p["bb"].reshape(-1, 1)]

    wm32 = jnp.concatenate(wvo_list + w1_list + [wa], axis=0)          # (496, 32)
    wm128 = jnp.concatenate(w2_list, axis=0)                           # (96, 128)
    vecs = jnp.concatenate(vec_cols, axis=0).astype(jnp.float32)       # (1025, 1)
    vecs = jnp.pad(vecs, ((0, _VEC_ROWS - vecs.shape[0]), (0, 0)))     # (1032, 1)

    assert wp.shape == (HIDDEN, INPUT_DIM)
    assert wm32.shape == (_WM32_ROWS, HIDDEN)
    assert wm128.shape == (_WM128_ROWS, LANES)
    assert vecs.shape == (_VEC_ROWS, 1)
    return wp, wm32, wm128, vecs


# ----------------------------------------------------------------------------
# Wrapper
# ----------------------------------------------------------------------------
@functools.partial(jax.jit, static_argnames=("tile_b",))
def _forward(x, wp, wm32, wm128, vecs, *, tile_b):
    B = x.shape[0]
    Bp = _round_up(B, tile_b)
    xT = x.T.astype(jnp.bfloat16)                      # (16, B) feature-major, bf16
    if Bp != B:
        xT = jnp.pad(xT, ((0, 0), (0, Bp - B)))
    n_tiles = Bp // tile_b

    out = pl.pallas_call(
        chem_transformer_kernel,
        out_shape=jax.ShapeDtypeStruct((8, Bp), jnp.float32),
        grid=(n_tiles,),
        in_specs=[
            # batch tile of x^T streams through the pipeline
            pl.BlockSpec((INPUT_DIM, tile_b), lambda i: (0, i)),
            # weight slabs: constant block index -> DMA'd once, stay resident
            pl.BlockSpec(wp.shape, lambda i: (0, 0)),
            pl.BlockSpec(wm32.shape, lambda i: (0, 0)),
            pl.BlockSpec(wm128.shape, lambda i: (0, 0)),
            pl.BlockSpec(vecs.shape, lambda i: (0, 0)),
        ],
        out_specs=pl.BlockSpec((8, tile_b), lambda i: (0, i)),
        compiler_params=pltpu.CompilerParams(
            dimension_semantics=("parallel",)),        # both TCs on v7x
    )(xT, wp, wm32, wm128, vecs)
    return out[0, :B]


def _choose_tile_b(B, tile_b):
    Bp = _round_up(B, LANES)                   # lane granularity
    tb = min(tile_b, Bp)
    # v7x has 2 TensorCores: keep >= 2 grid steps when the batch allows it
    if Bp // tb < 2 and Bp >= 2 * LANES:
        tb = _round_up((Bp + 1) // 2, LANES)
    return tb


def chem_transformer(x, packed, *, tile_b=2048):
    """packed = prepare_params(params); done once, reused across calls."""
    if x.ndim == 1:
        x = x[None, :]
    x = x.astype(jnp.float32)
    tb = _choose_tile_b(x.shape[0], tile_b)
    return _forward(x, *packed, tile_b=tb)


# ----------------------------------------------------------------------------
# Pure-JAX reference of the original (unfused) module math, for verification
# ----------------------------------------------------------------------------
def _layernorm_rows(x, gamma, beta):
    mu = jnp.mean(x, axis=-1, keepdims=True)
    var = jnp.mean((x - mu) ** 2, axis=-1, keepdims=True)
    return (x - mu) * jax.lax.rsqrt(var + EPS) * gamma + beta


def reference(x, p):
    hp = jax.lax.Precision.HIGHEST
    if x.ndim == 1:
        x = x[None, :]
    h = jnp.dot(x, p["wp"].T, precision=hp) + p["bp"]
    for l in range(NUM_LAYERS):
        v = jnp.dot(h, p["wv"][l].T, precision=hp) + p["bv"][l]
        sa = jnp.dot(v, p["wo"][l].T, precision=hp) + p["bo"][l]
        h = _layernorm_rows(h + sa, p["g1"][l], p["be1"][l])
        ff = jnp.maximum(jnp.dot(h, p["w1"][l].T, precision=hp) + p["bf1"][l], 0.0)
        ff = jnp.dot(ff, p["w2"][l].T, precision=hp) + p["bf2"][l]
        h = _layernorm_rows(h + ff, p["g2"][l], p["be2"][l])
    y = jnp.maximum(jnp.dot(h, p["wa"].T, precision=hp) + p["ba"], 0.0)
    y = jnp.dot(y, p["wb"].T, precision=hp) + p["bb"]
    return y[:, 0]


if __name__ == "__main__":
    key = jax.random.PRNGKey(0)
    kx, kp = jax.random.split(key)
    params = init_params(kp)
    packed = prepare_params(params)          # one-time host-side packing

    # bf16 MXU operands (f32 accumulation): expect ~1e-2-scale deviations vs the
    # f32 Precision.HIGHEST reference, so tolerances carry tail margin.
    ATOL = RTOL = 1e-1

    # small batch (single grid step)
    x = jax.random.normal(kx, (BATCH, INPUT_DIM), jnp.float32)
    out = jax.block_until_ready(chem_transformer(x, packed))
    ref = jax.block_until_ready(reference(x, params))
    assert out.shape == (BATCH,), out.shape
    assert jnp.allclose(out, ref, atol=ATOL, rtol=RTOL), (out, ref)

    # larger batch exercising the pipelined batch grid (2 tiles of 512)
    x2 = jax.random.normal(kx, (1024, INPUT_DIM), jnp.float32)
    out2 = jax.block_until_ready(chem_transformer(x2, packed))
    ref2 = jax.block_until_ready(reference(x2, params))
    assert out2.shape == (1024,), out2.shape
    assert jnp.allclose(out2, ref2, atol=ATOL, rtol=RTOL)

    print("KERNEL_OK")
</pallas_src>

<mosaic_0001>
module attributes {stable_mosaic.version = 11 : i64} {
  func.func @chem_transformer_kernel(%arg0: i32, %arg1: memref<16x128xbf16, #tpu.memory_space<vmem>>, %arg2: memref<32x16xbf16, #tpu.memory_space<vmem>>, %arg3: memref<496x32xbf16, #tpu.memory_space<vmem>>, %arg4: memref<96x128xbf16, #tpu.memory_space<vmem>>, %arg5: memref<1032x1xf32, #tpu.memory_space<vmem>>, %arg6: memref<8x128xf32, #tpu.memory_space<vmem>>) attributes {dimension_semantics = [#tpu.dimension_semantics<parallel>], iteration_bounds = array<i64: 1>, scalar_prefetch = 0 : i64, scratch_operands = 0 : i64, tpu.core_type = #tpu.core_type<tc>, window_params = [{transform_indices = @transform_0, window_bounds = array<i64: 16, 128>}, {pipeline_mode = #tpu.pipeline_mode<synchronous>, transform_indices = @transform_1, window_bounds = array<i64: 32, 16>}, {pipeline_mode = #tpu.pipeline_mode<synchronous>, transform_indices = @transform_2, window_bounds = array<i64: 496, 32>}, {pipeline_mode = #tpu.pipeline_mode<synchronous>, transform_indices = @transform_3, window_bounds = array<i64: 96, 128>}, {pipeline_mode = #tpu.pipeline_mode<synchronous>, transform_indices = @transform_4, window_bounds = array<i64: 1032, 1>}, {transform_indices = @transform_5, window_bounds = array<i64: 8, 128>}]} {
    %c0 = arith.constant 0 : index
    %c0_0 = arith.constant 0 : index
    %0 = vector.load %arg2[%c0, %c0_0] : memref<32x16xbf16, #tpu.memory_space<vmem>>, vector<32x16xbf16>
    %c0_1 = arith.constant 0 : index
    %c0_2 = arith.constant 0 : index
    %1 = vector.load %arg1[%c0_1, %c0_2] : memref<16x128xbf16, #tpu.memory_space<vmem>>, vector<16x128xbf16>
    %cst = arith.constant dense<0.000000e+00> : vector<32x128xf32>
    %2 = tpu.matmul %0, %1, %cst {dimension_numbers = #tpu.dot_dimension_numbers<[1], [0], [0], [1], [0, 0, 1, 1], [], []>} : vector<32x16xbf16>, vector<16x128xbf16>, vector<32x128xf32> -> vector<32x128xf32>
    %c0_3 = arith.constant 0 : index
    %c0_4 = arith.constant 0 : index
    %3 = vector.load %arg5[%c0_3, %c0_4] : memref<1032x1xf32, #tpu.memory_space<vmem>>, vector<32x1xf32>
    %4 = vector.broadcast %3 : vector<32x1xf32> to vector<32x128xf32>
    %5 = arith.addf %2, %4 : vector<32x128xf32>
    %c0_5 = arith.constant 0 : index
    %c0_6 = arith.constant 0 : index
    %6 = vector.load %arg3[%c0_5, %c0_6] : memref<496x32xbf16, #tpu.memory_space<vmem>>, vector<32x32xbf16>
    %c96 = arith.constant 96 : index
    %c0_7 = arith.constant 0 : index
    %7 = vector.load %arg3[%c96, %c0_7] : memref<496x32xbf16, #tpu.memory_space<vmem>>, vector<128x32xbf16>
    %c0_8 = arith.constant 0 : index
    %c0_9 = arith.constant 0 : index
    %8 = vector.load %arg4[%c0_8, %c0_9] : memref<96x128xbf16, #tpu.memory_space<vmem>>, vector<32x128xbf16>
    %c32 = arith.constant 32 : index
    %c0_10 = arith.constant 0 : index
    %9 = vector.load %arg5[%c32, %c0_10] : memref<1032x1xf32, #tpu.memory_space<vmem>>, vector<32x1xf32>
    %c64 = arith.constant 64 : index
    %c0_11 = arith.constant 0 : index
    %10 = vector.load %arg5[%c64, %c0_11] : memref<1032x1xf32, #tpu.memory_space<vmem>>, vector<32x1xf32>
    %c96_12 = arith.constant 96 : index
    %c0_13 = arith.constant 0 : index
    %11 = vector.load %arg5[%c96_12, %c0_13] : memref<1032x1xf32, #tpu.memory_space<vmem>>, vector<32x1xf32>
    %c128 = arith.constant 128 : index
    %c0_14 = arith.constant 0 : index
    %12 = vector.load %arg5[%c128, %c0_14] : memref<1032x1xf32, #tpu.memory_space<vmem>>, vector<128x1xf32>
    %c256 = arith.constant 256 : index
    %c0_15 = arith.constant 0 : index
    %13 = vector.load %arg5[%c256, %c0_15] : memref<1032x1xf32, #tpu.memory_space<vmem>>, vector<32x1xf32>
    %c288 = arith.constant 288 : index
    %c0_16 = arith.constant 0 : index
    %14 = vector.load %arg5[%c288, %c0_16] : memref<1032x1xf32, #tpu.memory_space<vmem>>, vector<32x1xf32>
    %c320 = arith.constant 320 : index
    %c0_17 = arith.constant 0 : index
    %15 = vector.load %arg5[%c320, %c0_17] : memref<1032x1xf32, #tpu.memory_space<vmem>>, vector<32x1xf32>
    %16 = arith.truncf %5 : vector<32x128xf32> to vector<32x128xbf16>
    %cst_18 = arith.constant dense<0.000000e+00> : vector<32x128xf32>
    %17 = tpu.matmul %6, %16, %cst_18 {dimension_numbers = #tpu.dot_dimension_numbers<[1], [0], [0], [1], [0, 0, 1, 1], [], []>} : vector<32x32xbf16>, vector<32x128xbf16>, vector<32x128xf32> -> vector<32x128xf32>
    %18 = vector.broadcast %9 : vector<32x1xf32> to vector<32x128xf32>
    %19 = arith.addf %17, %18 : vector<32x128xf32>
    %20 = arith.addf %5, %19 : vector<32x128xf32>
    %cst_19 = arith.constant dense<0.000000e+00> : vector<128xf32>
    %21 = vector.multi_reduction <add>, %20, %cst_19 [0] : vector<32x128xf32> to vector<128xf32>
    %22 = vector.shape_cast %21 : vector<128xf32> to vector<1x128xf32>
    %cst_20 = arith.constant 3.200000e+01 : f32
    %23 = vector.broadcast %cst_20 : f32 to vector<1x128xf32>
    %24 = arith.divf %22, %23 : vector<1x128xf32>
    %25 = arith.mulf %20, %20 : vector<32x128xf32>
    %cst_21 = arith.constant dense<0.000000e+00> : vector<128xf32>
    %26 = vector.multi_reduction <add>, %25, %cst_21 [0] : vector<32x128xf32> to vector<128xf32>
    %27 = vector.shape_cast %26 : vector<128xf32> to vector<1x128xf32>
    %cst_22 = arith.constant 3.200000e+01 : f32
    %28 = vector.broadcast %cst_22 : f32 to vector<1x128xf32>
    %29 = arith.divf %27, %28 : vector<1x128xf32>
    %30 = arith.mulf %24, %24 : vector<1x128xf32>
    %31 = arith.subf %29, %30 : vector<1x128xf32>
    %32 = vector.broadcast %24 : vector<1x128xf32> to vector<32x128xf32>
    %33 = arith.subf %20, %32 : vector<32x128xf32>
    %cst_23 = arith.constant 9.99999974E-6 : f32
    %34 = vector.broadcast %cst_23 : f32 to vector<1x128xf32>
    %35 = arith.addf %31, %34 : vector<1x128xf32>
    %36 = math.rsqrt %35 : vector<1x128xf32>
    %37 = vector.broadcast %36 : vector<1x128xf32> to vector<32x128xf32>
    %38 = arith.mulf %33, %37 : vector<32x128xf32>
    %39 = vector.broadcast %10 : vector<32x1xf32> to vector<32x128xf32>
    %40 = arith.mulf %38, %39 : vector<32x128xf32>
    %41 = vector.broadcast %11 : vector<32x1xf32> to vector<32x128xf32>
    %42 = arith.addf %40, %41 : vector<32x128xf32>
    %43 = arith.truncf %42 : vector<32x128xf32> to vector<32x128xbf16>
    %cst_24 = arith.constant dense<0.000000e+00> : vector<128x128xf32>
    %44 = tpu.matmul %7, %43, %cst_24 {dimension_numbers = #tpu.dot_dimension_numbers<[1], [0], [0], [1], [0, 0, 1, 1], [], []>} : vector<128x32xbf16>, vector<32x128xbf16>, vector<128x128xf32> -> vector<128x128xf32>
    %45 = vector.broadcast %12 : vector<128x1xf32> to vector<128x128xf32>
    %46 = arith.addf %44, %45 : vector<128x128xf32>
    %cst_25 = arith.constant 0.000000e+00 : f32
    %47 = vector.broadcast %cst_25 : f32 to vector<128x128xf32>
    %48 = arith.maximumf %46, %47 : vector<128x128xf32>
    %49 = arith.truncf %48 : vector<128x128xf32> to vector<128x128xbf16>
    %cst_26 = arith.constant dense<0.000000e+00> : vector<32x128xf32>
    %50 = tpu.matmul %8, %49, %cst_26 {dimension_numbers = #tpu.dot_dimension_numbers<[1], [0], [0], [1], [0, 0, 1, 1], [], []>} : vector<32x128xbf16>, vector<128x128xbf16>, vector<32x128xf32> -> vector<32x128xf32>
    %51 = vector.broadcast %13 : vector<32x1xf32> to vector<32x128xf32>
    %52 = arith.addf %50, %51 : vector<32x128xf32>
    %53 = arith.addf %42, %52 : vector<32x128xf32>
    %cst_27 = arith.constant dense<0.000000e+00> : vector<128xf32>
    %54 = vector.multi_reduction <add>, %53, %cst_27 [0] : vector<32x128xf32> to vector<128xf32>
    %55 = vector.shape_cast %54 : vector<128xf32> to vector<1x128xf32>
    %cst_28 = arith.constant 3.200000e+01 : f32
    %56 = vector.broadcast %cst_28 : f32 to vector<1x128xf32>
    %57 = arith.divf %55, %56 : vector<1x128xf32>
    %58 = arith.mulf %53, %53 : vector<32x128xf32>
    %cst_29 = arith.constant dense<0.000000e+00> : vector<128xf32>
    %59 = vector.multi_reduction <add>, %58, %cst_29 [0] : vector<32x128xf32> to vector<128xf32>
    %60 = vector.shape_cast %59 : vector<128xf32> to vector<1x128xf32>
    %cst_30 = arith.constant 3.200000e+01 : f32
    %61 = vector.broadcast %cst_30 : f32 to vector<1x128xf32>
    %62 = arith.divf %60, %61 : vector<1x128xf32>
    %63 = arith.mulf %57, %57 : vector<1x128xf32>
    %64 = arith.subf %62, %63 : vector<1x128xf32>
    %65 = vector.broadcast %57 : vector<1x128xf32> to vector<32x128xf32>
    %66 = arith.subf %53, %65 : vector<32x128xf32>
    %cst_31 = arith.constant 9.99999974E-6 : f32
    %67 = vector.broadcast %cst_31 : f32 to vector<1x128xf32>
    %68 = arith.addf %64, %67 : vector<1x128xf32>
    %69 = math.rsqrt %68 : vector<1x128xf32>
    %70 = vector.broadcast %69 : vector<1x128xf32> to vector<32x128xf32>
    %71 = arith.mulf %66, %70 : vector<32x128xf32>
    %72 = vector.broadcast %14 : vector<32x1xf32> to vector<32x128xf32>
    %73 = arith.mulf %71, %72 : vector<32x128xf32>
    %74 = vector.broadcast %15 : vector<32x1xf32> to vector<32x128xf32>
    %75 = arith.addf %73, %74 : vector<32x128xf32>
    %c32_32 = arith.constant 32 : index
    %c0_33 = arith.constant 0 : index
    %76 = vector.load %arg3[%c32_32, %c0_33] : memref<496x32xbf16, #tpu.memory_space<vmem>>, vector<32x32xbf16>
    %c224 = arith.constant 224 : index
    %c0_34 = arith.constant 0 : index
    %77 = vector.load %arg3[%c224, %c0_34] : memref<496x32xbf16, #tpu.memory_space<vmem>>, vector<128x32xbf16>
    %c32_35 = arith.constant 32 : index
    %c0_36 = arith.constant 0 : index
    %78 = vector.load %arg4[%c32_35, %c0_36] : memref<96x128xbf16, #tpu.memory_space<vmem>>, vector<32x128xbf16>
    %c352 = arith.constant 352 : index
    %c0_37 = arith.constant 0 : index
    %79 = vector.load %arg5[%c352, %c0_37] : memref<1032x1xf32, #tpu.memory_space<vmem>>, vector<32x1xf32>
    %c384 = arith.constant 384 : index
    %c0_38 = arith.constant 0 : index
    %80 = vector.load %arg5[%c384, %c0_38] : memref<1032x1xf32, #tpu.memory_space<vmem>>, vector<32x1xf32>
    %c416 = arith.constant 416 : index
    %c0_39 = arith.constant 0 : index
    %81 = vector.load %arg5[%c416, %c0_39] : memref<1032x1xf32, #tpu.memory_space<vmem>>, vector<32x1xf32>
    %c448 = arith.constant 448 : index
    %c0_40 = arith.constant 0 : index
    %82 = vector.load %arg5[%c448, %c0_40] : memref<1032x1xf32, #tpu.memory_space<vmem>>, vector<128x1xf32>
    %c576 = arith.constant 576 : index
    %c0_41 = arith.constant 0 : index
    %83 = vector.load %arg5[%c576, %c0_41] : memref<1032x1xf32, #tpu.memory_space<vmem>>, vector<32x1xf32>
    %c608 = arith.constant 608 : index
    %c0_42 = arith.constant 0 : index
    %84 = vector.load %arg5[%c608, %c0_42] : memref<1032x1xf32, #tpu.memory_space<vmem>>, vector<32x1xf32>
    %c640 = arith.constant 640 : index
    %c0_43 = arith.constant 0 : index
    %85 = vector.load %arg5[%c640, %c0_43] : memref<1032x1xf32, #tpu.memory_space<vmem>>, vector<32x1xf32>
    %86 = arith.truncf %75 : vector<32x128xf32> to vector<32x128xbf16>
    %cst_44 = arith.constant dense<0.000000e+00> : vector<32x128xf32>
    %87 = tpu.matmul %76, %86, %cst_44 {dimension_numbers = #tpu.dot_dimension_numbers<[1], [0], [0], [1], [0, 0, 1, 1], [], []>} : vector<32x32xbf16>, vector<32x128xbf16>, vector<32x128xf32> -> vector<32x128xf32>
    %88 = vector.broadcast %79 : vector<32x1xf32> to vector<32x128xf32>
    %89 = arith.addf %87, %88 : vector<32x128xf32>
    %90 = arith.addf %75, %89 : vector<32x128xf32>
    %cst_45 = arith.constant dense<0.000000e+00> : vector<128xf32>
    %91 = vector.multi_reduction <add>, %90, %cst_45 [0] : vector<32x128xf32> to vector<128xf32>
    %92 = vector.shape_cast %91 : vector<128xf32> to vector<1x128xf32>
    %cst_46 = arith.constant 3.200000e+01 : f32
    %93 = vector.broadcast %cst_46 : f32 to vector<1x128xf32>
    %94 = arith.divf %92, %93 : vector<1x128xf32>
    %95 = arith.mulf %90, %90 : vector<32x128xf32>
    %cst_47 = arith.constant dense<0.000000e+00> : vector<128xf32>
    %96 = vector.multi_reduction <add>, %95, %cst_47 [0] : vector<32x128xf32> to vector<128xf32>
    %97 = vector.shape_cast %96 : vector<128xf32> to vector<1x128xf32>
    %cst_48 = arith.constant 3.200000e+01 : f32
    %98 = vector.broadcast %cst_48 : f32 to vector<1x128xf32>
    %99 = arith.divf %97, %98 : vector<1x128xf32>
    %100 = arith.mulf %94, %94 : vector<1x128xf32>
    %101 = arith.subf %99, %100 : vector<1x128xf32>
    %102 = vector.broadcast %94 : vector<1x128xf32> to vector<32x128xf32>
    %103 = arith.subf %90, %102 : vector<32x128xf32>
    %cst_49 = arith.constant 9.99999974E-6 : f32
    %104 = vector.broadcast %cst_49 : f32 to vector<1x128xf32>
    %105 = arith.addf %101, %104 : vector<1x128xf32>
    %106 = math.rsqrt %105 : vector<1x128xf32>
    %107 = vector.broadcast %106 : vector<1x128xf32> to vector<32x128xf32>
    %108 = arith.mulf %103, %107 : vector<32x128xf32>
    %109 = vector.broadcast %80 : vector<32x1xf32> to vector<32x128xf32>
    %110 = arith.mulf %108, %109 : vector<32x128xf32>
    %111 = vector.broadcast %81 : vector<32x1xf32> to vector<32x128xf32>
    %112 = arith.addf %110, %111 : vector<32x128xf32>
    %113 = arith.truncf %112 : vector<32x128xf32> to vector<32x128xbf16>
    %cst_50 = arith.constant dense<0.000000e+00> : vector<128x128xf32>
    %114 = tpu.matmul %77, %113, %cst_50 {dimension_numbers = #tpu.dot_dimension_numbers<[1], [0], [0], [1], [0, 0, 1, 1], [], []>} : vector<128x32xbf16>, vector<32x128xbf16>, vector<128x128xf32> -> vector<128x128xf32>
    %115 = vector.broadcast %82 : vector<128x1xf32> to vector<128x128xf32>
    %116 = arith.addf %114, %115 : vector<128x128xf32>
    %cst_51 = arith.constant 0.000000e+00 : f32
    %117 = vector.broadcast %cst_51 : f32 to vector<128x128xf32>
    %118 = arith.maximumf %116, %117 : vector<128x128xf32>
    %119 = arith.truncf %118 : vector<128x128xf32> to vector<128x128xbf16>
    %cst_52 = arith.constant dense<0.000000e+00> : vector<32x128xf32>
    %120 = tpu.matmul %78, %119, %cst_52 {dimension_numbers = #tpu.dot_dimension_numbers<[1], [0], [0], [1], [0, 0, 1, 1], [], []>} : vector<32x128xbf16>, vector<128x128xbf16>, vector<32x128xf32> -> vector<32x128xf32>
    %121 = vector.broadcast %83 : vector<32x1xf32> to vector<32x128xf32>
    %122 = arith.addf %120, %121 : vector<32x128xf32>
    %123 = arith.addf %112, %122 : vector<32x128xf32>
    %cst_53 = arith.constant dense<0.000000e+00> : vector<128xf32>
    %124 = vector.multi_reduction <add>, %123, %cst_53 [0] : vector<32x128xf32> to vector<128xf32>
    %125 = vector.shape_cast %124 : vector<128xf32> to vector<1x128xf32>
    %cst_54 = arith.constant 3.200000e+01 : f32
    %126 = vector.broadcast %cst_54 : f32 to vector<1x128xf32>
    %127 = arith.divf %125, %126 : vector<1x128xf32>
    %128 = arith.mulf %123, %123 : vector<32x128xf32>
    %cst_55 = arith.constant dense<0.000000e+00> : vector<128xf32>
    %129 = vector.multi_reduction <add>, %128, %cst_55 [0] : vector<32x128xf32> to vector<128xf32>
    %130 = vector.shape_cast %129 : vector<128xf32> to vector<1x128xf32>
    %cst_56 = arith.constant 3.200000e+01 : f32
    %131 = vector.broadcast %cst_56 : f32 to vector<1x128xf32>
    %132 = arith.divf %130, %131 : vector<1x128xf32>
    %133 = arith.mulf %127, %127 : vector<1x128xf32>
    %134 = arith.subf %132, %133 : vector<1x128xf32>
    %135 = vector.broadcast %127 : vector<1x128xf32> to vector<32x128xf32>
    %136 = arith.subf %123, %135 : vector<32x128xf32>
    %cst_57 = arith.constant 9.99999974E-6 : f32
    %137 = vector.broadcast %cst_57 : f32 to vector<1x128xf32>
    %138 = arith.addf %134, %137 : vector<1x128xf32>
    %139 = math.rsqrt %138 : vector<1x128xf32>
    %140 = vector.broadcast %139 : vector<1x128xf32> to vector<32x128xf32>
    %141 = arith.mulf %136, %140 : vector<32x128xf32>
    %142 = vector.broadcast %84 : vector<32x1xf32> to vector<32x128xf32>
    %143 = arith.mulf %141, %142 : vector<32x128xf32>
    %144 = vector.broadcast %85 : vector<32x1xf32> to vector<32x128xf32>
    %145 = arith.addf %143, %144 : vector<32x128xf32>
    %c64_58 = arith.constant 64 : index
    %c0_59 = arith.constant 0 : index
    %146 = vector.load %arg3[%c64_58, %c0_59] : memref<496x32xbf16, #tpu.memory_space<vmem>>, vector<32x32xbf16>
    %c352_60 = arith.constant 352 : index
    %c0_61 = arith.constant 0 : index
    %147 = vector.load %arg3[%c352_60, %c0_61] : memref<496x32xbf16, #tpu.memory_space<vmem>>, vector<128x32xbf16>
    %c64_62 = arith.constant 64 : index
    %c0_63 = arith.constant 0 : index
    %148 = vector.load %arg4[%c64_62, %c0_63] : memref<96x128xbf16, #tpu.memory_space<vmem>>, vector<32x128xbf16>
    %c672 = arith.constant 672 : index
    %c0_64 = arith.constant 0 : index
    %149 = vector.load %arg5[%c672, %c0_64] : memref<1032x1xf32, #tpu.memory_space<vmem>>, vector<32x1xf32>
    %c704 = arith.constant 704 : index
    %c0_65 = arith.constant 0 : index
    %150 = vector.load %arg5[%c704, %c0_65] : memref<1032x1xf32, #tpu.memory_space<vmem>>, vector<32x1xf32>
    %c736 = arith.constant 736 : index
    %c0_66 = arith.constant 0 : index
    %151 = vector.load %arg5[%c736, %c0_66] : memref<1032x1xf32, #tpu.memory_space<vmem>>, vector<32x1xf32>
    %c768 = arith.constant 768 : index
    %c0_67 = arith.constant 0 : index
    %152 = vector.load %arg5[%c768, %c0_67] : memref<1032x1xf32, #tpu.memory_space<vmem>>, vector<128x1xf32>
    %c896 = arith.constant 896 : index
    %c0_68 = arith.constant 0 : index
    %153 = vector.load %arg5[%c896, %c0_68] : memref<1032x1xf32, #tpu.memory_space<vmem>>, vector<32x1xf32>
    %c928 = arith.constant 928 : index
    %c0_69 = arith.constant 0 : index
    %154 = vector.load %arg5[%c928, %c0_69] : memref<1032x1xf32, #tpu.memory_space<vmem>>, vector<32x1xf32>
    %c960 = arith.constant 960 : index
    %c0_70 = arith.constant 0 : index
    %155 = vector.load %arg5[%c960, %c0_70] : memref<1032x1xf32, #tpu.memory_space<vmem>>, vector<32x1xf32>
    %156 = arith.truncf %145 : vector<32x128xf32> to vector<32x128xbf16>
    %cst_71 = arith.constant dense<0.000000e+00> : vector<32x128xf32>
    %157 = tpu.matmul %146, %156, %cst_71 {dimension_numbers = #tpu.dot_dimension_numbers<[1], [0], [0], [1], [0, 0, 1, 1], [], []>} : vector<32x32xbf16>, vector<32x128xbf16>, vector<32x128xf32> -> vector<32x128xf32>
    %158 = vector.broadcast %149 : vector<32x1xf32> to vector<32x128xf32>
    %159 = arith.addf %157, %158 : vector<32x128xf32>
    %160 = arith.addf %145, %159 : vector<32x128xf32>
    %cst_72 = arith.constant dense<0.000000e+00> : vector<128xf32>
    %161 = vector.multi_reduction <add>, %160, %cst_72 [0] : vector<32x128xf32> to vector<128xf32>
    %162 = vector.shape_cast %161 : vector<128xf32> to vector<1x128xf32>
    %cst_73 = arith.constant 3.200000e+01 : f32
    %163 = vector.broadcast %cst_73 : f32 to vector<1x128xf32>
    %164 = arith.divf %162, %163 : vector<1x128xf32>
    %165 = arith.mulf %160, %160 : vector<32x128xf32>
    %cst_74 = arith.constant dense<0.000000e+00> : vector<128xf32>
    %166 = vector.multi_reduction <add>, %165, %cst_74 [0] : vector<32x128xf32> to vector<128xf32>
    %167 = vector.shape_cast %166 : vector<128xf32> to vector<1x128xf32>
    %cst_75 = arith.constant 3.200000e+01 : f32
    %168 = vector.broadcast %cst_75 : f32 to vector<1x128xf32>
    %169 = arith.divf %167, %168 : vector<1x128xf32>
    %170 = arith.mulf %164, %164 : vector<1x128xf32>
    %171 = arith.subf %169, %170 : vector<1x128xf32>
    %172 = vector.broadcast %164 : vector<1x128xf32> to vector<32x128xf32>
    %173 = arith.subf %160, %172 : vector<32x128xf32>
    %cst_76 = arith.constant 9.99999974E-6 : f32
    %174 = vector.broadcast %cst_76 : f32 to vector<1x128xf32>
    %175 = arith.addf %171, %174 : vector<1x128xf32>
    %176 = math.rsqrt %175 : vector<1x128xf32>
    %177 = vector.broadcast %176 : vector<1x128xf32> to vector<32x128xf32>
    %178 = arith.mulf %173, %177 : vector<32x128xf32>
    %179 = vector.broadcast %150 : vector<32x1xf32> to vector<32x128xf32>
    %180 = arith.mulf %178, %179 : vector<32x128xf32>
    %181 = vector.broadcast %151 : vector<32x1xf32> to vector<32x128xf32>
    %182 = arith.addf %180, %181 : vector<32x128xf32>
    %183 = arith.truncf %182 : vector<32x128xf32> to vector<32x128xbf16>
    %cst_77 = arith.constant dense<0.000000e+00> : vector<128x128xf32>
    %184 = tpu.matmul %147, %183, %cst_77 {dimension_numbers = #tpu.dot_dimension_numbers<[1], [0], [0], [1], [0, 0, 1, 1], [], []>} : vector<128x32xbf16>, vector<32x128xbf16>, vector<128x128xf32> -> vector<128x128xf32>
    %185 = vector.broadcast %152 : vector<128x1xf32> to vector<128x128xf32>
    %186 = arith.addf %184, %185 : vector<128x128xf32>
    %cst_78 = arith.constant 0.000000e+00 : f32
    %187 = vector.broadcast %cst_78 : f32 to vector<128x128xf32>
    %188 = arith.maximumf %186, %187 : vector<128x128xf32>
    %189 = arith.truncf %188 : vector<128x128xf32> to vector<128x128xbf16>
    %cst_79 = arith.constant dense<0.000000e+00> : vector<32x128xf32>
    %190 = tpu.matmul %148, %189, %cst_79 {dimension_numbers = #tpu.dot_dimension_numbers<[1], [0], [0], [1], [0, 0, 1, 1], [], []>} : vector<32x128xbf16>, vector<128x128xbf16>, vector<32x128xf32> -> vector<32x128xf32>
    %191 = vector.broadcast %153 : vector<32x1xf32> to vector<32x128xf32>
    %192 = arith.addf %190, %191 : vector<32x128xf32>
    %193 = arith.addf %182, %192 : vector<32x128xf32>
    %cst_80 = arith.constant dense<0.000000e+00> : vector<128xf32>
    %194 = vector.multi_reduction <add>, %193, %cst_80 [0] : vector<32x128xf32> to vector<128xf32>
    %195 = vector.shape_cast %194 : vector<128xf32> to vector<1x128xf32>
    %cst_81 = arith.constant 3.200000e+01 : f32
    %196 = vector.broadcast %cst_81 : f32 to vector<1x128xf32>
    %197 = arith.divf %195, %196 : vector<1x128xf32>
    %198 = arith.mulf %193, %193 : vector<32x128xf32>
    %cst_82 = arith.constant dense<0.000000e+00> : vector<128xf32>
    %199 = vector.multi_reduction <add>, %198, %cst_82 [0] : vector<32x128xf32> to vector<128xf32>
    %200 = vector.shape_cast %199 : vector<128xf32> to vector<1x128xf32>
    %cst_83 = arith.constant 3.200000e+01 : f32
    %201 = vector.broadcast %cst_83 : f32 to vector<1x128xf32>
    %202 = arith.divf %200, %201 : vector<1x128xf32>
    %203 = arith.mulf %197, %197 : vector<1x128xf32>
    %204 = arith.subf %202, %203 : vector<1x128xf32>
    %205 = vector.broadcast %197 : vector<1x128xf32> to vector<32x128xf32>
    %206 = arith.subf %193, %205 : vector<32x128xf32>
    %cst_84 = arith.constant 9.99999974E-6 : f32
    %207 = vector.broadcast %cst_84 : f32 to vector<1x128xf32>
    %208 = arith.addf %204, %207 : vector<1x128xf32>
    %209 = math.rsqrt %208 : vector<1x128xf32>
    %210 = vector.broadcast %209 : vector<1x128xf32> to vector<32x128xf32>
    %211 = arith.mulf %206, %210 : vector<32x128xf32>
    %212 = vector.broadcast %154 : vector<32x1xf32> to vector<32x128xf32>
    %213 = arith.mulf %211, %212 : vector<32x128xf32>
    %214 = vector.broadcast %155 : vector<32x1xf32> to vector<32x128xf32>
    %215 = arith.addf %213, %214 : vector<32x128xf32>
    %c480 = arith.constant 480 : index
    %c0_85 = arith.constant 0 : index
    %216 = vector.load %arg3[%c480, %c0_85] : memref<496x32xbf16, #tpu.memory_space<vmem>>, vector<16x32xbf16>
    %c992 = arith.constant 992 : index
    %c0_86 = arith.constant 0 : index
    %217 = vector.load %arg5[%c992, %c0_86] : memref<1032x1xf32, #tpu.memory_space<vmem>>, vector<16x1xf32>
    %c1008 = arith.constant 1008 : index
    %c0_87 = arith.constant 0 : index
    %218 = vector.load %arg5[%c1008, %c0_87] : memref<1032x1xf32, #tpu.memory_space<vmem>>, vector<16x1xf32>
    %c1024 = arith.constant 1024 : index
    %c0_88 = arith.constant 0 : index
    %219 = vector.load %arg5[%c1024, %c0_88] : memref<1032x1xf32, #tpu.memory_space<vmem>>, vector<1x1xf32>
    %220 = arith.truncf %215 : vector<32x128xf32> to vector<32x128xbf16>
    %cst_89 = arith.constant dense<0.000000e+00> : vector<16x128xf32>
    %221 = tpu.matmul %216, %220, %cst_89 {dimension_numbers = #tpu.dot_dimension_numbers<[1], [0], [0], [1], [0, 0, 1, 1], [], []>} : vector<16x32xbf16>, vector<32x128xbf16>, vector<16x128xf32> -> vector<16x128xf32>
    %222 = vector.broadcast %217 : vector<16x1xf32> to vector<16x128xf32>
    %223 = arith.addf %221, %222 : vector<16x128xf32>
    %cst_90 = arith.constant 0.000000e+00 : f32
    %224 = vector.broadcast %cst_90 : f32 to vector<16x128xf32>
    %225 = arith.maximumf %223, %224 : vector<16x128xf32>
    %226 = vector.broadcast %218 : vector<16x1xf32> to vector<16x128xf32>
    %227 = arith.mulf %225, %226 : vector<16x128xf32>
    %cst_91 = arith.constant dense<0.000000e+00> : vector<128xf32>
    %228 = vector.multi_reduction <add>, %227, %cst_91 [0] : vector<16x128xf32> to vector<128xf32>
    %229 = vector.shape_cast %228 : vector<128xf32> to vector<1x128xf32>
    %230 = vector.broadcast %219 : vector<1x1xf32> to vector<1x128xf32>
    %231 = arith.addf %229, %230 : vector<1x128xf32>
    %232 = vector.shape_cast %231 : vector<1x128xf32> to vector<1x128xf32>
    %233 = vector.broadcast %232 : vector<1x128xf32> to vector<8x128xf32>
    %c0_92 = arith.constant 0 : index
    %c0_93 = arith.constant 0 : index
    %234 = vector.load %arg6[%c0_92, %c0_93] : memref<8x128xf32, #tpu.memory_space<vmem>>, vector<8x128xf32>
    tpu.vector_store %arg6[%c0_92, %c0_93], %233 {strides = array<i32>} : memref<8x128xf32, #tpu.memory_space<vmem>>, vector<8x128xf32>,
    return
  }
  func.func @transform_0(%arg0: i32) -> (i32, i32) {
    %c0_i32 = arith.constant 0 : i32
    %c0_i32_0 = arith.constant 0 : i32
    return %c0_i32, %arg0 : i32, i32
  }
  func.func @transform_1(%arg0: i32) -> (i32, i32) {
    %c0_i32 = arith.constant 0 : i32
    %c0_i32_0 = arith.constant 0 : i32
    %c0_i32_1 = arith.constant 0 : i32
    return %c0_i32, %c0_i32_0 : i32, i32
  }
  func.func @transform_2(%arg0: i32) -> (i32, i32) {
    %c0_i32 = arith.constant 0 : i32
    %c0_i32_0 = arith.constant 0 : i32
    %c0_i32_1 = arith.constant 0 : i32
    return %c0_i32, %c0_i32_0 : i32, i32
  }
  func.func @transform_3(%arg0: i32) -> (i32, i32) {
    %c0_i32 = arith.constant 0 : i32
    %c0_i32_0 = arith.constant 0 : i32
    %c0_i32_1 = arith.constant 0 : i32
    return %c0_i32, %c0_i32_0 : i32, i32
  }
  func.func @transform_4(%arg0: i32) -> (i32, i32) {
    %c0_i32 = arith.constant 0 : i32
    %c0_i32_0 = arith.constant 0 : i32
    %c0_i32_1 = arith.constant 0 : i32
    return %c0_i32, %c0_i32_0 : i32, i32
  }
  func.func @transform_5(%arg0: i32) -> (i32, i32) {
    %c0_i32 = arith.constant 0 : i32
    %c0_i32_0 = arith.constant 0 : i32
    return %c0_i32, %arg0 : i32, i32
  }
}

</mosaic_0001>

<bundles_post_ra>
// kernel: _forward.1
= control target key start
LH: loop header
LB: loop body
LE: loop exit
PB: predicated region body
PF: predicated region fallthrough
CT: control target
= control target key end

     0   :  { %v2187_v0 = vmov 0   ;;  %vm67_vm0 = vcmask 130048   ;;  %vm189_vm1 = vcmask 261120   ;;  %s2868_s4 = inlined_call_operand.vmem [shape: f32[1032,1], index: 4, kind: input, shape index: {}]   ;;  %s2869_s0 = inlined_call_operand.vmem [shape: bf16[16,128], index: 0, kind: input, shape index: {}]   ;;  %s2870_s1 = inlined_call_operand.vmem [shape: bf16[32,16], index: 1, kind: input, shape index: {}]   ;;  %s2871_s2 = inlined_call_operand.vmem [shape: bf16[496,32], index: 2, kind: input, shape index: {}]   ;;  %s2872_s3 = inlined_call_operand.vmem [shape: bf16[96,128], index: 3, kind: input, shape index: {}]   ;;  %s2873_s5 = inlined_call_operand.vmem [shape: f32[8,128], index: 5, kind: output, shape index: {}]  }
   0x1   :  { %2172 = vset.pattern.permute.xlu2 %v2187_v0  ;;  %2171 = vset.pattern.permute.xlu1 %v2187_v0  ;;  %v117_v1 = vld [vmem:[%s2868_s4 + $0x20] sm:$0xff]  ;;  %v29_v2 = vld [vmem:[%s2868_s4 + $0x10] sm:$0xff]  ;;  %v2124_v5 = vld [vmem:[%s2870_s1 + $0x8] sm:$0xff] }
   0x2   :  { %v27_v3 = vld [vmem:[%s2868_s4] sm:$0xff]  ;;  %2170 = vset.pattern.permute.xlu0 %v2187_v0  ;;  %161 = vperm.xlu2 %2172, %v117_v1   ;;  %v118_v7 = vld [vmem:[%s2868_s4 + $0x28] sm:$0xff]  ;;  %v30_v8 = vld [vmem:[%s2868_s4 + $0x18] sm:$0xff] }
   0x3   :  { %v2125_v4 = vld [vmem:[%s2869_s0] sm:$0xff]  ;;  %43 = vperm.xlu0 %2170, %v29_v2   ;;  %33 = vperm.xlu1 %2171, %v27_v3   ;;  %v28_v9 = vld [vmem:[%s2868_s4 + $0x8] sm:$0xff]  ;;  %v123_v10 = vld [vmem:[%s2868_s4 + $0x50] sm:$0xff] }
   0x4   :  { %v2123_v6 = vld [vmem:[%s2870_s1] sm:$0xff]  ;;  %2163 = vmatpush.bf16.msra.mxu2 %v2125_v4  ;;  %81 = vmatpush.bf16.msra.mxu0 %v2125_v4  ;;  %v119_v11 = vld [vmem:[%s2868_s4 + $0x30] sm:$0xff]  ;;  %v120_v12 = vld [vmem:[%s2868_s4 + $0x38] sm:$0xff] }
   0x5   :  { %v128_v13 = vld [vmem:[%s2868_s4 + $0x78] sm:$0xff]  ;;  %v127_v15 = vld [vmem:[%s2868_s4 + $0x70] sm:$0xff]  ;;  %v125_v16 = vld [vmem:[%s2868_s4 + $0x60] sm:$0xff] }
   0x6   :  { %v124_v14 = vld [vmem:[%s2868_s4 + $0x58] sm:$0xff]  ;;  %v121_v17 = vld [vmem:[%s2868_s4 + $0x40] sm:$0xff]  ;;  %v122_v18 = vld [vmem:[%s2868_s4 + $0x48] sm:$0xff] }
   0x7   :  { %1943 = vmatmul.msk.bf16.vlgmr.msra.gmra.mxu2 %vm67_vm0, %v2124_v5  ;;  %1942 = vmatmul.msk.bf16.vlgmr.msra.gmra.mxu0 %vm67_vm0, %v2123_v6  ;;  %v144_v19 = vld [vmem:[%s2868_s4 + $0xf8] sm:$0xff]  ;;  %v126_v20 = vld [vmem:[%s2868_s4 + $0x68] sm:$0xff]  ;;  %v143_v21 = vld [vmem:[%s2868_s4 + $0xf0] sm:$0xff] }
   0x8   :  { %v139_v22 = vld [vmem:[%s2868_s4 + $0xd0] sm:$0xff]  ;;  %v141_v23 = vld [vmem:[%s2868_s4 + $0xe0] sm:$0xff]  ;;  %v142_v24 = vld [vmem:[%s2868_s4 + $0xe8] sm:$0xff] }
   0x9   :  { %v138_v25 = vld [vmem:[%s2868_s4 + $0xc8] sm:$0xff]  ;;  %v140_v26 = vld [vmem:[%s2868_s4 + $0xd8] sm:$0xff]  ;;  %v137_v27 = vld [vmem:[%s2868_s4 + $0xc0] sm:$0xff] }
   0xa   :  { %166 = vperm.xlu2 %2172, %v118_v7   ;;  %v133_v28 = vld [vmem:[%s2868_s4 + $0xa0] sm:$0xff]  ;;  %v135_v29 = vld [vmem:[%s2868_s4 + $0xb0] sm:$0xff]  ;;  %v136_v30 = vld [vmem:[%s2868_s4 + $0xb8] sm:$0xff] }
   0xb   :  { %48 = vperm.xlu0 %2170, %v30_v8   ;;  %38 = vperm.xlu1 %2171, %v28_v9   ;;  %v132_v31 = vld [vmem:[%s2868_s4 + $0x98] sm:$0xff]  ;;  %v134_v32 = vld [vmem:[%s2868_s4 + $0xa8] sm:$0xff]  ;;  %v131_v33 = vld [vmem:[%s2868_s4 + $0x90] sm:$0xff] }
   0xc   :  { %v145_v34 = vld [vmem:[%s2868_s4 + $0x100] sm:$0xff]  ;;  %v130_v36 = vld [vmem:[%s2868_s4 + $0x88] sm:$0xff]  ;;  %v148_v37 = vld [vmem:[%s2868_s4 + $0x118] sm:$0xff] }
   0xd   :  { %v129_v35 = vld [vmem:[%s2868_s4 + $0x80] sm:$0xff]  ;;  %v146_v38 = vld [vmem:[%s2868_s4 + $0x108] sm:$0xff]  ;;  %v147_v39 = vld [vmem:[%s2868_s4 + $0x110] sm:$0xff] }
   0xe   :  { %v155_v40 = vld [vmem:[%s2868_s4 + $0x150] sm:$0xff]  ;;  %v152_v42 = vld [vmem:[%s2868_s4 + $0x138] sm:$0xff]  ;;  %v150_v43 = vld [vmem:[%s2868_s4 + $0x128] sm:$0xff] }
   0xf   :  { %v151_v41 = vld [vmem:[%s2868_s4 + $0x130] sm:$0xff]  ;;  %v156_v44 = vld [vmem:[%s2868_s4 + $0x158] sm:$0xff]  ;;  %v149_v45 = vld [vmem:[%s2868_s4 + $0x120] sm:$0xff] }
  0x10   :  { %v710_v46 = vld [vmem:[%s2868_s4 + $0x160] sm:$0xff]  ;;  %v154_v48 = vld [vmem:[%s2868_s4 + $0x148] sm:$0xff]  ;;  %v713_v49 = vld [vmem:[%s2868_s4 + $0x178] sm:$0xff] }
  0x11   :  { %v153_v47 = vld [vmem:[%s2868_s4 + $0x140] sm:$0xff]  ;;  %v711_v50 = vld [vmem:[%s2868_s4 + $0x168] sm:$0xff]  ;;  %v712_v51 = vld [vmem:[%s2868_s4 + $0x170] sm:$0xff] }
  0x12   :  { %283 = vperm.xlu2 %2172, %v123_v10   ;;  %v720_v52 = vld [vmem:[%s2868_s4 + $0x1b0] sm:$0xff]  ;;  %v717_v54 = vld [vmem:[%s2868_s4 + $0x198] sm:$0xff]  ;;  %v715_v55 = vld [vmem:[%s2868_s4 + $0x188] sm:$0xff] }
  0x13   :  { %171 = vperm.xlu0 %2170, %v119_v11   ;;  %176 = vperm.xlu1 %2171, %v120_v12   ;;  %v716_v53 = vld [vmem:[%s2868_s4 + $0x190] sm:$0xff]  ;;  %v721_v57 = vld [vmem:[%s2868_s4 + $0x1b8] sm:$0xff]  ;;  %v714_v58 = vld [vmem:[%s2868_s4 + $0x180] sm:$0xff] }
  0x14   :  { %v736_v62 = vld [vmem:[%s2868_s4 + $0x230] sm:$0xff]  ;;  %v718_v63 = vld [vmem:[%s2868_s4 + $0x1a0] sm:$0xff]  ;;  %v719_v0 = vld [vmem:[%s2868_s4 + $0x1a8] sm:$0xff] }
  0x15   :  { %v735_v10 = vld [vmem:[%s2868_s4 + $0x228] sm:$0xff]  ;;  %v737_v11 = vld [vmem:[%s2868_s4 + $0x238] sm:$0xff]  ;;  %v734_v12 = vld [vmem:[%s2868_s4 + $0x220] sm:$0xff] }
  0x1a   :  { %312 = vperm.xlu2 %2172, %v128_v13  }
  0x1b   :  { %288 = vperm.xlu0 %2170, %v124_v14   ;;  %307 = vperm.xlu1 %2171, %v127_v15   ;;  %v2126_v14 = vld [vmem:[%s2871_s2] sm:$0xff] }
  0x1c   :  { %v730_v15 = vld [vmem:[%s2868_s4 + $0x200] sm:$0xff] }
  0x22   :  { %297 = vperm.xlu2 %2172, %v125_v16   ;;  %v732_v16 = vld [vmem:[%s2868_s4 + $0x210] sm:$0xff] }
  0x23   :  { %273 = vperm.xlu0 %2170, %v121_v17   ;;  %278 = vperm.xlu1 %2171, %v122_v18   ;;  %v733_v17 = vld [vmem:[%s2868_s4 + $0x218] sm:$0xff] }
  0x24   :  { %v729_v18 = vld [vmem:[%s2868_s4 + $0x1f8] sm:$0xff] }
  0x2a   :  { %398 = vperm.xlu2 %2172, %v144_v19   ;;  %v731_v19 = vld [vmem:[%s2868_s4 + $0x208] sm:$0xff] }
  0x2b   :  { %302 = vperm.xlu0 %2170, %v126_v20   ;;  %393 = vperm.xlu1 %2171, %v143_v21   ;;  %v728_v20 = vld [vmem:[%s2868_s4 + $0x1f0] sm:$0xff]  ;;  %v2127_v21 = vld [vmem:[%s2871_s2 + $0x8] sm:$0xff] }
  0x32   :  { %373 = vperm.xlu2 %2172, %v139_v22   ;;  %v724_v22 = vld [vmem:[%s2868_s4 + $0x1d0] sm:$0xff] }
  0x33   :  { %383 = vperm.xlu0 %2170, %v141_v23   ;;  %388 = vperm.xlu1 %2171, %v142_v24   ;;  %v726_v23 = vld [vmem:[%s2868_s4 + $0x1e0] sm:$0xff]  ;;  %v727_v24 = vld [vmem:[%s2868_s4 + $0x1e8] sm:$0xff] }
  0x3a   :  { %368 = vperm.xlu2 %2172, %v138_v25   ;;  %v723_v25 = vld [vmem:[%s2868_s4 + $0x1c8] sm:$0xff] }
  0x3b   :  { %378 = vperm.xlu0 %2170, %v140_v26   ;;  %363 = vperm.xlu1 %2171, %v137_v27   ;;  %v725_v26 = vld [vmem:[%s2868_s4 + $0x1d8] sm:$0xff]  ;;  %v722_v27 = vld [vmem:[%s2868_s4 + $0x1c0] sm:$0xff] }
  0x42   :  { %343 = vperm.xlu2 %2172, %v133_v28   ;;  %v740_v28 = vld [vmem:[%s2868_s4 + $0x250] sm:$0xff] }
  0x43   :  { %353 = vperm.xlu0 %2170, %v135_v29   ;;  %358 = vperm.xlu1 %2171, %v136_v30   ;;  %v738_v29 = vld [vmem:[%s2868_s4 + $0x240] sm:$0xff]  ;;  %v739_v30 = vld [vmem:[%s2868_s4 + $0x248] sm:$0xff] }
  0x4a   :  { %338 = vperm.xlu2 %2172, %v132_v31   ;;  %v745_v31 = vld [vmem:[%s2868_s4 + $0x278] sm:$0xff] }
  0x4b   :  { %348 = vperm.xlu0 %2170, %v134_v32   ;;  %333 = vperm.xlu1 %2171, %v131_v33   ;;  %v741_v32 = vld [vmem:[%s2868_s4 + $0x258] sm:$0xff]  ;;  %v744_v33 = vld [vmem:[%s2868_s4 + $0x270] sm:$0xff] }
  0x52   :  { %540 = vperm.xlu2 %2172, %v145_v34   ;;  %v742_v34 = vld [vmem:[%s2868_s4 + $0x260] sm:$0xff] }
  0x53   :  { %323 = vperm.xlu0 %2170, %v129_v35   ;;  %328 = vperm.xlu1 %2171, %v130_v36   ;;  %v748_v35 = vld [vmem:[%s2868_s4 + $0x290] sm:$0xff]  ;;  %v749_v36 = vld [vmem:[%s2868_s4 + $0x298] sm:$0xff] }
  0x5a   :  { %555 = vperm.xlu2 %2172, %v148_v37   ;;  %v747_v37 = vld [vmem:[%s2868_s4 + $0x288] sm:$0xff] }
  0x5b   :  { %545 = vperm.xlu0 %2170, %v146_v38   ;;  %550 = vperm.xlu1 %2171, %v147_v39   ;;  %v743_v38 = vld [vmem:[%s2868_s4 + $0x268] sm:$0xff]  ;;  %v746_v39 = vld [vmem:[%s2868_s4 + $0x280] sm:$0xff] }
  0x62   :  { %674 = vperm.xlu2 %2172, %v155_v40   ;;  %v1297_v40 = vld [vmem:[%s2868_s4 + $0x2b0] sm:$0xff] }
  0x63   :  { %650 = vperm.xlu0 %2170, %v151_v41   ;;  %655 = vperm.xlu1 %2171, %v152_v42   ;;  %v1295_v41 = vld [vmem:[%s2868_s4 + $0x2a0] sm:$0xff]  ;;  %v1296_v42 = vld [vmem:[%s2868_s4 + $0x2a8] sm:$0xff] }
  0x6a   :  { %645 = vperm.xlu2 %2172, %v150_v43   ;;  %v1302_v43 = vld [vmem:[%s2868_s4 + $0x2d8] sm:$0xff] }
  0x6b   :  { %679 = vperm.xlu0 %2170, %v156_v44   ;;  %640 = vperm.xlu1 %2171, %v149_v45   ;;  %v1298_v44 = vld [vmem:[%s2868_s4 + $0x2b8] sm:$0xff]  ;;  %v1301_v45 = vld [vmem:[%s2868_s4 + $0x2d0] sm:$0xff] }
  0x72   :  { %754 = vperm.xlu2 %2172, %v710_v46   ;;  %v1299_v46 = vld [vmem:[%s2868_s4 + $0x2c0] sm:$0xff] }
  0x73   :  { %664 = vperm.xlu0 %2170, %v153_v47   ;;  %669 = vperm.xlu1 %2171, %v154_v48   ;;  %v1305_v47 = vld [vmem:[%s2868_s4 + $0x2f0] sm:$0xff]  ;;  %v1306_v48 = vld [vmem:[%s2868_s4 + $0x2f8] sm:$0xff] }
  0x75   :  { %v44_v56 = vpop.permute.xlu0 %43  ;;  %v34_v61 = vpop.permute.xlu1 %33 }
  0x7a   :  { %769 = vperm.xlu2 %2172, %v713_v49   ;;  %v1304_v49 = vld [vmem:[%s2868_s4 + $0x2e8] sm:$0xff] }
  0x7b   :  { %759 = vperm.xlu0 %2170, %v711_v50   ;;  %764 = vperm.xlu1 %2171, %v712_v51   ;;  %v1300_v50 = vld [vmem:[%s2868_s4 + $0x2c8] sm:$0xff]  ;;  %v1303_v51 = vld [vmem:[%s2868_s4 + $0x2e0] sm:$0xff] }
  0x7d   :  { %v49_v1 = vpop.permute.xlu0 %48  ;;  %v39_v6 = vpop.permute.xlu1 %38 }
  0x82   :  { %892 = vperm.xlu2 %2172, %v720_v52   ;;  %v1319_v52 = vld [vmem:[%s2868_s4 + $0x360] sm:$0xff] }
  0x83   :  { %868 = vperm.xlu0 %2170, %v716_v53   ;;  %873 = vperm.xlu1 %2171, %v717_v54   ;;  %v1321_v53 = vld [vmem:[%s2868_s4 + $0x370] sm:$0xff]  ;;  %v1322_v54 = vld [vmem:[%s2868_s4 + $0x378] sm:$0xff] }
  0x84   :  { %v83_v59 = vpop.f32.mrf.mxu0 }
  0x85   :  { %v2405_v8 = vadd.f32 %v83_v59, %v34_v61  ;;  %v1315_v59 = vld [vmem:[%s2868_s4 + $0x340] sm:$0xff]  ;;  %v1312_v61 = vld [vmem:[%s2868_s4 + $0x328] sm:$0xff] }
  0x8a   :  { %863 = vperm.xlu2 %2172, %v715_v55   ;;  %v88_v60 = vpop.f32.mrf.mxu2  ;;  %v1318_v55 = vld [vmem:[%s2868_s4 + $0x358] sm:$0xff] }
  0x8b   :  { %897 = vperm.xlu0 %2170, %v721_v57   ;;  %858 = vperm.xlu1 %2171, %v714_v58   ;;  %v2399_v3 = vadd.f32 %v88_v60, %v44_v56  ;;  %v1320_v56 = vld [vmem:[%s2868_s4 + $0x368] sm:$0xff]  ;;  %v1317_v57 = vld [vmem:[%s2868_s4 + $0x350] sm:$0xff] }
  0x8c   :  { %v85_v4 = vpop.f32.mrf.mxu0  ;;  %v1313_v58 = vld [vmem:[%s2868_s4 + $0x330] sm:$0xff]  ;;  %v1316_v60 = vld [vmem:[%s2868_s4 + $0x348] sm:$0xff] }
  0x8d   :  { %v2407_v9 = vadd.f32 %v85_v4, %v39_v6  ;;  %v1309_v4 = vld [vmem:[%s2868_s4 + $0x310] sm:$0xff]  ;;  %v1310_v6 = vld [vmem:[%s2868_s4 + $0x318] sm:$0xff] }
  0x8f   :  { %v157_v13 = vpack.c.bf16 %v2407_v9, %v2405_v8 }
  0x92   :  { %978 = vperm.xlu2 %2172, %v736_v62   ;;  %v90_v2 = vpop.f32.mrf.mxu2  ;;  %v1314_v62 = vld [vmem:[%s2868_s4 + $0x338] sm:$0xff] }
  0x93   :  { %882 = vperm.xlu0 %2170, %v718_v63   ;;  %887 = vperm.xlu1 %2171, %v719_v0   ;;  %v2401_v5 = vadd.f32 %v90_v2, %v49_v1  ;;  %v1311_v63 = vld [vmem:[%s2868_s4 + $0x320] sm:$0xff]  ;;  %v162_v2 = vpop.permute.xlu2 %161 }
  0x94   :  { %v1307_v1 = vld [vmem:[%s2868_s4 + $0x300] sm:$0xff] }
  0x95   :  { %v158_v7 = vpack.c.bf16 %v2401_v5, %v2399_v3 }
  0x97   :  { %202 = vmatpush.bf16.msra.mxu1 %v158_v7 }
  0x9a   :  { %973 = vperm.xlu2 %2172, %v735_v10   ;;  %v1324_v10 = vld [vmem:[%s2868_s4 + $0x388] sm:$0xff] }
  0x9b   :  { %983 = vperm.xlu0 %2170, %v737_v11   ;;  %968 = vperm.xlu1 %2171, %v734_v12   ;;  %v1308_v11 = vld [vmem:[%s2868_s4 + $0x308] sm:$0xff]  ;;  %v1323_v12 = vld [vmem:[%s2868_s4 + $0x380] sm:$0xff] }
  0x9c   :  { %203 = vmatpush.bf16.msra.mxu1 %v157_v13  ;;  %v167_v13 = vpop.permute.xlu2 %166 }
  0x9f   :  { %1952 = vmatmul.msk.bf16.vlgmr.msra.gmra.mxu1 %vm189_vm1, %v2126_v14 }
  0xa2   :  { %948 = vperm.xlu2 %2172, %v730_v15   ;;  %v2188_v15 = vmov 32.0  }
  0xa3   :  { %958 = vperm.xlu0 %2170, %v732_v16   ;;  %963 = vperm.xlu1 %2171, %v733_v17   ;;  %2173 = vrcp.f32 %v2188_v15  ;;  %v172_v16 = vpop.permute.xlu0 %171 }
  0xaa   :  { %943 = vperm.xlu2 %2172, %v729_v18  }
  0xab   :  { %953 = vperm.xlu0 %2170, %v731_v19   ;;  %938 = vperm.xlu1 %2171, %v728_v20  }
  0xaf   :  { %1953 = vmatmul.msk.bf16.gmra.mxu1 %vm189_vm1, %v2127_v21  ;;  %v1329_v21 = vld [vmem:[%s2868_s4 + $0x3b0] sm:$0xff] }
  0xb2   :  { %918 = vperm.xlu2 %2172, %v724_v22   ;;  %v1325_v22 = vld [vmem:[%s2868_s4 + $0x390] sm:$0xff] }
  0xb3   :  { %928 = vperm.xlu0 %2170, %v726_v23   ;;  %933 = vperm.xlu1 %2171, %v727_v24   ;;  %v1326_v23 = vld [vmem:[%s2868_s4 + $0x398] sm:$0xff]  ;;  %v2174_v24 = vpop.eup %2173 }
  0xb4   :  { %vm233_vm2 = vweird.f32 %v2174_v24 }
  0xba   :  { %913 = vperm.xlu2 %2172, %v723_v25  }
  0xbb   :  { %923 = vperm.xlu0 %2170, %v725_v26   ;;  %908 = vperm.xlu1 %2171, %v722_v27   ;;  %v177_v27 = vpop.permute.xlu1 %176 }
  0xc2   :  { %1135 = vperm.xlu2 %2172, %v740_v28  }
  0xc3   :  { %1125 = vperm.xlu0 %2170, %v738_v29   ;;  %1130 = vperm.xlu1 %2171, %v739_v30   ;;  %v229_v29 = vmul.f32 32.0, %v2174_v24  ;;  %v308_v15 = vpop.permute.xlu1 %307 }
  0xca   :  { %1240 = vperm.xlu2 %2172, %v745_v31  }
  0xcb   :  { %1140 = vperm.xlu0 %2170, %v741_v32   ;;  %1235 = vperm.xlu1 %2171, %v744_v33  }
  0xd2   :  { %1225 = vperm.xlu2 %2172, %v742_v34  }
  0xd3   :  { %1259 = vperm.xlu0 %2170, %v748_v35   ;;  %1264 = vperm.xlu1 %2171, %v749_v36   ;;  %v1334_v35 = vld [vmem:[%s2868_s4 + $0x3d8] sm:$0xff]  ;;  %v230_v36 = vsub.f32 1.0, %v229_v29 }
  0xda   :  { %1254 = vperm.xlu2 %2172, %v747_v37   ;;  %v1330_v37 = vld [vmem:[%s2868_s4 + $0x3b8] sm:$0xff] }
  0xdb   :  { %1230 = vperm.xlu0 %2170, %v743_v38   ;;  %1249 = vperm.xlu1 %2171, %v746_v39   ;;  %v1333_v38 = vld [vmem:[%s2868_s4 + $0x3d0] sm:$0xff] }
  0xe2   :  { %1349 = vperm.xlu2 %2172, %v1297_v40  }
  0xe3   :  { %1339 = vperm.xlu0 %2170, %v1295_v41   ;;  %1344 = vperm.xlu1 %2171, %v1296_v42  }
  0xea   :  { %1458 = vperm.xlu2 %2172, %v1302_v43   ;;  %v231_v43 = vmul.f32 %v2174_v24, %v230_v36 }
  0xeb   :  { %1354 = vperm.xlu0 %2170, %v1298_v44   ;;  %1453 = vperm.xlu1 %2171, %v1301_v45  }
  0xf2   :  { %1443 = vperm.xlu2 %2172, %v1299_v46  }
  0xf3   :  { %1477 = vperm.xlu0 %2170, %v1305_v47   ;;  %1482 = vperm.xlu1 %2171, %v1306_v48   ;;  %v1331_v48 = vld [vmem:[%s2868_s4 + $0x3c0] sm:$0xff] }
  0xfa   :  { %1472 = vperm.xlu2 %2172, %v1304_v49   ;;  %v232_v49 = vadd.f32 %v2174_v24, %v231_v43  ;;  %v2131_v43 = vld [vmem:[%s2871_s2 + $0x48] sm:$0xff] }
  0xfb   :  { %1448 = vperm.xlu0 %2170, %v1300_v50   ;;  %1467 = vperm.xlu1 %2171, %v1303_v51   ;;  %v1327_v50 = vld [vmem:[%s2868_s4 + $0x3a0] sm:$0xff]  ;;  %v1328_v51 = vld [vmem:[%s2868_s4 + $0x3a8] sm:$0xff] }
 0x102   :  { %1553 = vperm.xlu2 %2172, %v1319_v52  }
 0x103   :  { %1563 = vperm.xlu0 %2170, %v1321_v53   ;;  %1568 = vperm.xlu1 %2171, %v1322_v54  }
 0x10a   :  { %1548 = vperm.xlu2 %2172, %v1318_v55  }
 0x10b   :  { %1558 = vperm.xlu0 %2170, %v1320_v56   ;;  %1543 = vperm.xlu1 %2171, %v1317_v57   ;;  %v2641_v56 = vsel %vm233_vm2, %v2174_v24, %v232_v49 }
 0x112   :  { %1523 = vperm.xlu2 %2172, %v1313_v58  }
 0x113   :  { %1533 = vperm.xlu0 %2170, %v1315_v59   ;;  %1538 = vperm.xlu1 %2171, %v1316_v60  }
 0x11a   :  { %1518 = vperm.xlu2 %2172, %v1312_v61   ;;  %v1859_v61 = vld [vmem:[%s2868_s4 + $0x3e8] sm:$0xff] }
 0x11b   :  { %1528 = vperm.xlu0 %2170, %v1314_v62   ;;  %1513 = vperm.xlu1 %2171, %v1311_v63   ;;  %v1332_v62 = vld [vmem:[%s2868_s4 + $0x3c8] sm:$0xff]  ;;  %v1858_v63 = vld [vmem:[%s2868_s4 + $0x3e0] sm:$0xff] }
 0x11c   :  { %v205_v0 = vpop.f32.mrf.mxu1 }
 0x11d   :  { %v206_v18 = vadd.f32 %v205_v0, %v162_v2 }
 0x11f   :  { %v2603_v25 = vadd.f32 %v206_v18, %v2405_v8 }
 0x121   :  { %v236_v30 = vmul.f32 %v2603_v25, %v2603_v25 }
 0x122   :  { %1493 = vperm.xlu2 %2172, %v1307_v1  }
 0x123   :  { %1503 = vperm.xlu0 %2170, %v1309_v4   ;;  %1508 = vperm.xlu1 %2171, %v1310_v6   ;;  %v1862_v6 = vld [vmem:[%s2868_s4 + $0x400] sm:$0x1] }
 0x124   :  { %v207_v7 = vpop.f32.mrf.mxu1 }
 0x125   :  { %v208_v14 = vadd.f32 %v207_v7, %v167_v13  ;;  %v1860_v7 = vld [vmem:[%s2868_s4 + $0x3f0] sm:$0xff] }
 0x127   :  { %v2591_v20 = vadd.f32 %v208_v14, %v2407_v9 }
 0x129   :  { %v237_v9 = vmul.f32 %v2591_v20, %v2591_v20  ;;  %v219_v31 = vadd.f32 %v2591_v20, %v2603_v25 }
 0x12a   :  { %1715 = vperm.xlu2 %2172, %v1324_v10   ;;  %v1861_v10 = vld [vmem:[%s2868_s4 + $0x3f8] sm:$0xff] }
 0x12b   :  { %1498 = vperm.xlu0 %2170, %v1308_v11   ;;  %1710 = vperm.xlu1 %2171, %v1323_v12   ;;  %v240_v32 = vadd.f32 %v237_v9, %v236_v30  ;;  %v284_v11 = vpop.permute.xlu2 %283  ;;  %v289_v12 = vpop.permute.xlu0 %288 }
 0x12c   :  { %v210_v17 = vpop.f32.mrf.mxu1 }
 0x12d   :  { %v211_v19 = vadd.f32 %v210_v17, %v172_v16 }
 0x12f   :  { %v2606_v26 = vadd.f32 %v211_v19, %v2399_v3 }
 0x131   :  { %v238_v8 = vmul.f32 %v2606_v26, %v2606_v26  ;;  %v220_v33 = vadd.f32 %v219_v31, %v2606_v26 }
 0x132   :  { %1820 = vperm.xlu2 %2172, %v1329_v21  }
 0x133   :  { %1720 = vperm.xlu0 %2170, %v1325_v22   ;;  %1725 = vperm.xlu1 %2171, %v1326_v23   ;;  %v241_v39 = vadd.f32 %v240_v32, %v238_v8  ;;  %v313_v18 = vpop.permute.xlu2 %312  ;;  %v274_v19 = vpop.permute.xlu0 %273 }
 0x134   :  { %v212_v28 = vpop.f32.mrf.mxu1 }
 0x135   :  { %v213_v3 = vadd.f32 %v212_v28, %v177_v27 }
 0x137   :  { %v2618_v34 = vadd.f32 %v213_v3, %v2401_v5  ;;  %v279_v3 = vpop.permute.xlu1 %278 }
 0x139   :  { %v221_v40 = vadd.f32 %v220_v33, %v2618_v34  ;;  %v239_v5 = vmul.f32 %v2618_v34, %v2618_v34 }
 0x13a   :  { %1849 = vperm.xlu2 %2172, %v1334_v35  }
 0x13b   :  { %v222_v41 = vrot.slane %v221_v40, 4  ;;  %v242_v42 = vadd.f32 %v241_v39, %v239_v5  ;;  %1825 = vperm.xlu0 %2170, %v1330_v37   ;;  %1844 = vperm.xlu1 %2171, %v1333_v38   ;;  %v303_v38 = vpop.permute.xlu0 %302  ;;  %v2128_v5 = vld [vmem:[%s2871_s2 + $0x30] sm:$0xff] }
 0x13d   :  { %v223_v44 = vadd.f32 %v222_v41, %v221_v40  ;;  %v243_v45 = vrot.slane %v242_v42, 4  ;;  %v2129_v41 = vld [vmem:[%s2871_s2 + $0x38] sm:$0xff] }
 0x13f   :  { %v224_v46 = vrot.slane %v223_v44, 2  ;;  %v244_v47 = vadd.f32 %v243_v45, %v242_v42  ;;  %v2130_v42 = vld [vmem:[%s2871_s2 + $0x40] sm:$0xff]  ;;  %v2133_v45 = vld [vmem:[%s2871_s2 + $0x58] sm:$0xff] }
 0x141   :  { %v225_v52 = vadd.f32 %v224_v46, %v223_v44  ;;  %v245_v53 = vrot.slane %v244_v47, 2  ;;  %v2132_v44 = vld [vmem:[%s2871_s2 + $0x50] sm:$0xff]  ;;  %v394_v46 = vpop.permute.xlu1 %393 }
 0x142   :  { %1834 = vperm.xlu2 %2172, %v1331_v48  }
 0x143   :  { %v226_v54 = vrot.slane %v225_v52, 1  ;;  %v246_v55 = vadd.f32 %v245_v53, %v244_v47  ;;  %1810 = vperm.xlu0 %2170, %v1327_v50   ;;  %1815 = vperm.xlu1 %2171, %v1328_v51   ;;  %v2134_v47 = vld [vmem:[%s2871_s2 + $0x60] sm:$0xff]  ;;  %v384_v48 = vpop.permute.xlu0 %383  ;;  %v2135_v51 = vld [vmem:[%s2871_s2 + $0x68] sm:$0xff] }
 0x145   :  { %v227_v57 = vadd.f32 %v226_v54, %v225_v52  ;;  %v247_v58 = vrot.slane %v246_v55, 1 }
 0x147   :  { %v235_v59 = vmul.f32 %v2641_v56, %v227_v57  ;;  %v248_v60 = vadd.f32 %v247_v58, %v246_v55 }
 0x149   :  { %v249_v0 = vmul.f32 %v248_v60, %v2641_v56  ;;  %v250_v1 = vmul.f32 %v235_v59, %v235_v59  ;;  %v255_v23 = vsub.f32 %v2618_v34, %v235_v59  ;;  %v254_v24 = vsub.f32 %v2606_v26, %v235_v59  ;;  %v298_v26 = vpop.permute.xlu2 %297  ;;  %v389_v49 = vpop.permute.xlu1 %388 }
 0x14a   :  { %1872 = vperm.xlu2 %2172, %v1859_v61   ;;  %v252_v9 = vsub.f32 %v2603_v25, %v235_v59  ;;  %v253_v27 = vsub.f32 %v2591_v20, %v235_v59 }
 0x14b   :  { %v251_v2 = vsub.f32 %v249_v0, %v250_v1  ;;  %1839 = vperm.xlu0 %2170, %v1332_v62   ;;  %1867 = vperm.xlu1 %2171, %v1858_v63   ;;  %v379_v50 = vpop.permute.xlu0 %378 }
 0x14d   :  { %v256_v4 = vadd.f32 1e-05, %v251_v2 }
 0x14f   :  { %2175 = vrsqrt.f32 %v256_v4  ;;  %vm263_vm4 = vweird.f32 %v256_v4 }
 0x151   :  { %v2710_v52 = vpop.permute.xlu1 %363  ;;  %v399_v53 = vpop.permute.xlu2 %398 }
 0x152   :  { %1920 = vperm.xlu2 %2172, %v1862_v6  }
 0x153   :  { %1901 = vperm.xlu0 %2170, %v1860_v7   ;;  %1906 = vperm.xlu1 %2171, %v1861_v10   ;;  %v354_v54 = vpop.permute.xlu0 %353 }
 0x155   :  { %v2176_v13 = vpop.eup %2175 }
 0x156   :  { %v258_v14 = vmul.f32 %v2176_v13, %v256_v4  ;;  %vm264_vm3 = vweird.f32 %v2176_v13 }
 0x157   :  { %vm265_vm5 = vmor %vm263_vm4, %vm264_vm3 }
 0x158   :  { %v259_v16 = vmul.f32 %v2176_v13, %v258_v14 }
 0x159   :  { %v359_v55 = vpop.permute.xlu1 %358  ;;  %v374_v57 = vpop.permute.xlu2 %373 }
 0x15a   :  { %v260_v17 = vmul.f32 0.5, %v259_v16 }
 0x15b   :  { %v349_v58 = vpop.permute.xlu0 %348 }
 0x15c   :  { %v261_v21 = vsub.f32 1.5, %v260_v17 }
 0x15e   :  { %v262_v22 = vmul.f32 %v2176_v13, %v261_v21 }
 0x160   :  { %v266_v28 = vsel %vm265_vm5, %v2176_v13, %v262_v22 }
 0x161   :  { %v269_v29 = vmul.f32 %v266_v28, %v254_v24  ;;  %v270_v30 = vmul.f32 %v266_v28, %v255_v23  ;;  %v267_v31 = vmul.f32 %v266_v28, %v252_v9  ;;  %v268_v8 = vmul.f32 %v266_v28, %v253_v27  ;;  %v334_v59 = vpop.permute.xlu1 %333  ;;  %v369_v61 = vpop.permute.xlu2 %368 }
 0x163   :  { %v293_v32 = vmul.f32 %v284_v11, %v269_v29  ;;  %v294_v33 = vmul.f32 %v289_v12, %v270_v30  ;;  %v291_v35 = vmul.f32 %v274_v19, %v267_v31  ;;  %v292_v36 = vmul.f32 %v279_v3, %v268_v8  ;;  %v324_v62 = vpop.permute.xlu0 %323 }
 0x165   :  { %v2667_v37 = vadd.f32 %v308_v15, %v293_v32  ;;  %v2669_v34 = vadd.f32 %v313_v18, %v294_v33  ;;  %v2673_v20 = vadd.f32 %v298_v26, %v291_v35  ;;  %v2675_v39 = vadd.f32 %v303_v38, %v292_v36 }
 0x167   :  { %v320_v25 = vpack.c.bf16 %v2669_v34, %v2667_v37  ;;  %v319_v40 = vpack.c.bf16 %v2675_v39, %v2673_v20 }
 0x169   :  { %471 = vmatpush.bf16.msrb.mxu2 %v320_v25  ;;  %v329_v0 = vpop.permute.xlu1 %328  ;;  %v344_v10 = vpop.permute.xlu2 %343 }
 0x16d   :  { %472 = vmatpush.bf16.msrb.mxu2 %v319_v40 }
 0x170   :  { %1986 = vmatmul.msk.bf16.vlgmr.msrb.gmra.mxu2 %vm189_vm1, %v2128_v5 }
 0x171   :  { %v339_v13 = vpop.permute.xlu2 %338 }
 0x180   :  { %1987 = vmatmul.msk.bf16.gmra.mxu2 %vm189_vm1, %v2129_v41 }
 0x190   :  { %1988 = vmatmul.msk.bf16.gmra.mxu2 %vm189_vm1, %v2130_v42 }
 0x1a0   :  { %1989 = vmatmul.msk.bf16.gmra.mxu2 %vm189_vm1, %v2131_v43 }
 0x1b0   :  { %1990 = vmatmul.msk.bf16.gmra.mxu2 %vm189_vm1, %v2132_v44 }
 0x1c0   :  { %1991 = vmatmul.msk.bf16.gmra.mxu2 %vm189_vm1, %v2133_v45 }
 0x1d0   :  { %1992 = vmatmul.msk.bf16.gmra.mxu2 %vm189_vm1, %v2134_v47 }
 0x1e0   :  { %1993 = vmatmul.msk.bf16.gmra.mxu2 %vm189_vm1, %v2135_v51 }
 0x1f3   :  { %v474_v60 = vpop.f32.mrf.mxu2 }
 0x1f4   :  { %v475_v63 = vadd.f32 %v474_v60, %v324_v62 }
 0x1f6   :  { %v514_v4 = vmax.f32 %v475_v63, 0.0 }
 0x1fb   :  { %v476_v1 = vpop.f32.mrf.mxu2 }
 0x1fc   :  { %v477_v2 = vadd.f32 %v476_v1, %v329_v0 }
 0x1fe   :  { %v515_v6 = vmax.f32 %v477_v2, 0.0 }
 0x200   :  { %v530_v7 = vpack.c.bf16 %v515_v6, %v514_v4  ;;  %v546_v4 = vpop.permute.xlu0 %545 }
 0x203   :  { %v479_v11 = vpop.f32.mrf.mxu2 }
 0x204   :  { %v480_v12 = vadd.f32 %v479_v11, %v334_v59 }
 0x206   :  { %v516_v16 = vmax.f32 %v480_v12, 0.0 }
 0x20b   :  { %v481_v14 = vpop.f32.mrf.mxu2 }
 0x20c   :  { %v482_v15 = vadd.f32 %v481_v14, %v339_v13 }
 0x20e   :  { %v517_v17 = vmax.f32 %v482_v15, 0.0 }
 0x210   :  { %v531_v18 = vpack.c.bf16 %v517_v17, %v516_v16 }
 0x213   :  { %v484_v19 = vpop.f32.mrf.mxu2 }
 0x214   :  { %v485_v21 = vadd.f32 %v484_v19, %v344_v10  ;;  %v551_v10 = vpop.permute.xlu1 %550 }
 0x216   :  { %v518_v24 = vmax.f32 %v485_v21, 0.0 }
 0x21b   :  { %v486_v22 = vpop.f32.mrf.mxu2 }
 0x21c   :  { %v487_v23 = vadd.f32 %v486_v22, %v349_v58 }
 0x21e   :  { %v519_v9 = vmax.f32 %v487_v23, 0.0 }
 0x220   :  { %v532_v27 = vpack.c.bf16 %v519_v9, %v518_v24 }
 0x223   :  { %v489_v28 = vpop.f32.mrf.mxu2 }
 0x224   :  { %v490_v29 = vadd.f32 %v489_v28, %v354_v54 }
 0x226   :  { %v520_v8 = vmax.f32 %v490_v29, 0.0 }
 0x22b   :  { %v491_v30 = vpop.f32.mrf.mxu2 }
 0x22c   :  { %v492_v31 = vadd.f32 %v491_v30, %v359_v55 }
 0x22e   :  { %v521_v3 = vmax.f32 %v492_v31, 0.0 }
 0x230   :  { %v533_v32 = vpack.c.bf16 %v521_v3, %v520_v8 }
 0x233   :  { %v494_v33 = vpop.f32.mrf.mxu2 }
 0x234   :  { %v495_v0 = vadd.f32 %v494_v33, %v2710_v52  ;;  %v2137_v52 = vld [vmem:[%s2872_s3 + $0x8] sm:$0xff] }
 0x23b   :  { %v496_v35 = vpop.f32.mrf.mxu2 }
 0x23c   :  { %v497_v60 = vadd.f32 %v496_v35, %v369_v61  ;;  %v541_v61 = vpop.permute.xlu2 %540 }
 0x243   :  { %v499_v36 = vpop.f32.mrf.mxu2 }
 0x244   :  { %v500_v58 = vadd.f32 %v499_v36, %v374_v57  ;;  %v556_v17 = vpop.permute.xlu2 %555 }
 0x246   :  { %v524_v1 = vmax.f32 %v500_v58, 0.0 }
 0x24b   :  { %v501_v26 = vpop.f32.mrf.mxu2 }
 0x24c   :  { %v502_v51 = vadd.f32 %v501_v26, %v379_v50  ;;  %v2136_v50 = vld [vmem:[%s2872_s3] sm:$0xff] }
 0x24e   :  { %v525_v62 = vmax.f32 %v502_v51, 0.0  ;;  %v675_v51 = vpop.permute.xlu2 %674 }
 0x250   :  { %v535_v2 = vpack.c.bf16 %v525_v62, %v524_v1 }
 0x253   :  { %v504_v38 = vpop.f32.mrf.mxu2 }
 0x254   :  { %v505_v44 = vadd.f32 %v504_v38, %v384_v48 }
 0x256   :  { %v526_v59 = vmax.f32 %v505_v44, 0.0  ;;  %v656_v44 = vpop.permute.xlu1 %655 }
 0x25b   :  { %v506_v25 = vpop.f32.mrf.mxu2 }
 0x25c   :  { %v507_v42 = vadd.f32 %v506_v25, %v389_v49  ;;  %v522_v49 = vmax.f32 %v495_v0, 0.0 }
 0x25e   :  { %v527_v54 = vmax.f32 %v507_v42, 0.0 }
 0x260   :  { %v536_v63 = vpack.c.bf16 %v527_v54, %v526_v59  ;;  %v641_v59 = vpop.permute.xlu1 %640 }
 0x263   :  { %v509_v40 = vpop.f32.mrf.mxu2 }
 0x264   :  { %v510_v5 = vadd.f32 %v509_v40, %v394_v46  ;;  %v523_v46 = vmax.f32 %v497_v60, 0.0 }
 0x266   :  { %v528_v45 = vmax.f32 %v510_v5, 0.0  ;;  %v534_v48 = vpack.c.bf16 %v523_v46, %v522_v49 }
 0x26b   :  { %v511_v41 = vpop.f32.mrf.mxu2 }
 0x26c   :  { %v512_v43 = vadd.f32 %v511_v41, %v399_v53 }
 0x26e   :  { %v529_v47 = vmax.f32 %v512_v43, 0.0  ;;  %v651_v43 = vpop.permute.xlu0 %650 }
 0x270   :  { %v537_v55 = vpack.c.bf16 %v529_v47, %v528_v45 }
 0x272   :  { %570 = vmatpush.bf16.msra.mxu3 %v537_v55 }
 0x276   :  { %571 = vmatpush.bf16.msra.mxu3 %v536_v63  ;;  %v680_v58 = vpop.permute.xlu0 %679 }
 0x27a   :  { %572 = vmatpush.bf16.msra.mxu3 %v535_v2 }
 0x27e   :  { %573 = vmatpush.bf16.msra.mxu3 %v534_v48 }
 0x282   :  { %574 = vmatpush.bf16.msra.mxu3 %v533_v32 }
 0x286   :  { %575 = vmatpush.bf16.msra.mxu3 %v532_v27 }
 0x28a   :  { %576 = vmatpush.bf16.msra.mxu3 %v531_v18 }
 0x28e   :  { %577 = vmatpush.bf16.msra.mxu3 %v530_v7 }
 0x291   :  { %578 = vmatmul.bf16.vlgmr.msra.gmra.mxu3 %v2136_v50 }
 0x2a1   :  { %583 = vmatmul.bf16.gmra.mxu3 %v2137_v52 }
 0x314   :  { %v579_v53 = vpop.f32.mrf.mxu3 }
 0x315   :  { %v580_v12 = vadd.f32 %v579_v53, %v541_v61  ;;  %v646_v53 = vpop.permute.xlu2 %645 }
 0x317   :  { %v589_v15 = vadd.f32 %v580_v12, %v2673_v20  ;;  %v665_v12 = vpop.permute.xlu0 %664 }
 0x319   :  { %v603_v19 = vmul.f32 %v589_v15, %v589_v15 }
 0x31c   :  { %v581_v57 = vpop.f32.mrf.mxu3 }
 0x31d   :  { %v582_v6 = vadd.f32 %v581_v57, %v546_v4 }
 0x31f   :  { %v590_v14 = vadd.f32 %v582_v6, %v2675_v39 }
 0x321   :  { %v604_v16 = vmul.f32 %v590_v14, %v590_v14  ;;  %v593_v21 = vadd.f32 %v590_v14, %v589_v15 }
 0x323   :  { %v607_v24 = vadd.f32 %v604_v16, %v603_v19 }
 0x324   :  { %v584_v11 = vpop.f32.mrf.mxu3 }
 0x325   :  { %v585_v13 = vadd.f32 %v584_v11, %v551_v10 }
 0x327   :  { %v591_v7 = vadd.f32 %v585_v13, %v2667_v37  ;;  %v670_v13 = vpop.permute.xlu1 %669 }
 0x329   :  { %v605_v22 = vmul.f32 %v591_v7, %v591_v7  ;;  %v594_v9 = vadd.f32 %v593_v21, %v591_v7 }
 0x32b   :  { %v608_v28 = vadd.f32 %v607_v24, %v605_v22  ;;  %v755_v22 = vpop.permute.xlu2 %754 }
 0x32c   :  { %v586_v18 = vpop.f32.mrf.mxu3 }
 0x32d   :  { %v587_v23 = vadd.f32 %v586_v18, %v556_v17  ;;  %v2139_v18 = vld [vmem:[%s2871_s2 + $0x18] sm:$0xff] }
 0x32f   :  { %v592_v27 = vadd.f32 %v587_v23, %v2669_v34  ;;  %v760_v23 = vpop.permute.xlu0 %759 }
 0x331   :  { %v595_v29 = vadd.f32 %v594_v9, %v592_v27  ;;  %v606_v30 = vmul.f32 %v592_v27, %v592_v27  ;;  %v765_v9 = vpop.permute.xlu1 %764 }
 0x333   :  { %v596_v31 = vrot.slane %v595_v29, 4  ;;  %v609_v39 = vadd.f32 %v608_v28, %v606_v30 }
 0x335   :  { %v597_v8 = vadd.f32 %v596_v31, %v595_v29  ;;  %v610_v20 = vrot.slane %v609_v39, 4 }
 0x337   :  { %v598_v3 = vrot.slane %v597_v8, 2  ;;  %v611_v37 = vadd.f32 %v610_v20, %v609_v39  ;;  %v770_v20 = vpop.permute.xlu2 %769 }
 0x339   :  { %v599_v32 = vadd.f32 %v598_v3, %v597_v8  ;;  %v612_v33 = vrot.slane %v611_v37, 2 }
 0x33b   :  { %v600_v35 = vrot.slane %v599_v32, 1  ;;  %v613_v36 = vadd.f32 %v612_v33, %v611_v37 }
 0x33d   :  { %v601_v26 = vadd.f32 %v600_v35, %v599_v32  ;;  %v614_v38 = vrot.slane %v613_v36, 1 }
 0x33f   :  { %v602_v25 = vmul.f32 %v601_v26, %v2641_v56  ;;  %v615_v40 = vadd.f32 %v614_v38, %v613_v36 }
 0x341   :  { %v616_v34 = vmul.f32 %v615_v40, %v2641_v56  ;;  %v617_v5 = vmul.f32 %v602_v25, %v602_v25  ;;  %v622_v63 = vsub.f32 %v592_v27, %v602_v25  ;;  %v621_v0 = vsub.f32 %v591_v7, %v602_v25 }
 0x342   :  { %v619_v1 = vsub.f32 %v589_v15, %v602_v25  ;;  %v620_v46 = vsub.f32 %v590_v14, %v602_v25  ;;  %v2138_v14 = vld [vmem:[%s2871_s2 + $0x10] sm:$0xff] }
 0x343   :  { %v618_v41 = vsub.f32 %v616_v34, %v617_v5 }
 0x345   :  { %v623_v42 = vadd.f32 1e-05, %v618_v41 }
 0x347   :  { %2177 = vrsqrt.f32 %v623_v42  ;;  %vm630_vm7 = vweird.f32 %v623_v42 }
 0x34d   :  { %v2178_v45 = vpop.eup %2177 }
 0x34e   :  { %v625_v47 = vmul.f32 %v2178_v45, %v623_v42  ;;  %vm631_vm6 = vweird.f32 %v2178_v45 }
 0x34f   :  { %vm632_vm8 = vmor %vm630_vm7, %vm631_vm6 }
 0x350   :  { %v626_v54 = vmul.f32 %v2178_v45, %v625_v47 }
 0x352   :  { %v627_v55 = vmul.f32 0.5, %v626_v54 }
 0x354   :  { %v628_v60 = vsub.f32 1.5, %v627_v55 }
 0x356   :  { %v629_v62 = vmul.f32 %v2178_v45, %v628_v60 }
 0x358   :  { %v633_v2 = vsel %vm632_vm8, %v2178_v45, %v629_v62 }
 0x359   :  { %v636_v49 = vmul.f32 %v633_v2, %v621_v0  ;;  %v637_v48 = vmul.f32 %v633_v2, %v622_v63  ;;  %v634_v50 = vmul.f32 %v633_v2, %v619_v1  ;;  %v635_v52 = vmul.f32 %v633_v2, %v620_v46  ;;  %v869_v2 = vpop.permute.xlu0 %868 }
 0x35b   :  { %v660_v57 = vmul.f32 %v651_v43, %v636_v49  ;;  %v661_v61 = vmul.f32 %v656_v44, %v637_v48  ;;  %v658_v4 = vmul.f32 %v641_v59, %v634_v50  ;;  %v659_v6 = vmul.f32 %v646_v53, %v635_v52  ;;  %v874_v49 = vpop.permute.xlu1 %873  ;;  %v893_v52 = vpop.permute.xlu2 %892 }
 0x35d   :  { %v684_v10 = vadd.f32 %v675_v51, %v660_v57  ;;  %v685_v11 = vadd.f32 %v680_v58, %v661_v61  ;;  %v682_v17 = vadd.f32 %v665_v12, %v658_v4  ;;  %v683_v7 = vadd.f32 %v670_v13, %v659_v6 }
 0x35f   :  { %v751_v16 = vpack.c.bf16 %v685_v11, %v684_v10  ;;  %v750_v15 = vpack.c.bf16 %v683_v7, %v682_v17 }
 0x361   :  { %794 = vmatpush.bf16.msrb.mxu0 %v751_v16  ;;  %v898_v61 = vpop.permute.xlu0 %897 }
 0x363   :  { %v859_v4 = vpop.permute.xlu1 %858 }
 0x365   :  { %795 = vmatpush.bf16.msrb.mxu0 %v750_v15 }
 0x368   :  { %2010 = vmatmul.msk.bf16.vlgmr.msrb.gmra.mxu0 %vm189_vm1, %v2138_v14 }
 0x378   :  { %2011 = vmatmul.msk.bf16.gmra.mxu0 %vm189_vm1, %v2139_v18 }
 0x3e5   :  { %v797_v19 = vpop.f32.mrf.mxu0 }
 0x3e6   :  { %v798_v28 = vadd.f32 %v797_v19, %v755_v22  ;;  %v864_v19 = vpop.permute.xlu2 %863 }
 0x3e8   :  { %v807_v31 = vadd.f32 %v798_v28, %v682_v17  ;;  %v883_v28 = vpop.permute.xlu0 %882 }
 0x3ea   :  { %v821_v37 = vmul.f32 %v807_v31, %v807_v31 }
 0x3ed   :  { %v799_v21 = vpop.f32.mrf.mxu0 }
 0x3ee   :  { %v800_v24 = vadd.f32 %v799_v21, %v760_v23 }
 0x3f0   :  { %v808_v30 = vadd.f32 %v800_v24, %v683_v7 }
 0x3f2   :  { %v822_v8 = vmul.f32 %v808_v30, %v808_v30  ;;  %v811_v32 = vadd.f32 %v808_v30, %v807_v31 }
 0x3f4   :  { %v825_v36 = vadd.f32 %v822_v8, %v821_v37  ;;  %v2142_v37 = vld [vmem:[%s2871_s2 + $0x80] sm:$0xff] }
 0x3f5   :  { %v802_v27 = vpop.f32.mrf.mxu0 }
 0x3f6   :  { %v803_v29 = vadd.f32 %v802_v27, %v765_v9 }
 0x3f8   :  { %v809_v39 = vadd.f32 %v803_v29, %v684_v10  ;;  %v888_v29 = vpop.permute.xlu1 %887 }
 0x3fa   :  { %v823_v33 = vmul.f32 %v809_v39, %v809_v39  ;;  %v812_v26 = vadd.f32 %v811_v32, %v809_v39  ;;  %v2143_v32 = vld [vmem:[%s2871_s2 + $0x88] sm:$0xff] }
 0x3fc   :  { %v826_v25 = vadd.f32 %v825_v36, %v823_v33  ;;  %v2144_v33 = vld [vmem:[%s2871_s2 + $0x90] sm:$0xff]  ;;  %v979_v36 = vpop.permute.xlu2 %978 }
 0x3fd   :  { %v804_v3 = vpop.f32.mrf.mxu0 }
 0x3fe   :  { %v805_v35 = vadd.f32 %v804_v3, %v770_v20  ;;  %v2140_v20 = vld [vmem:[%s2871_s2 + $0x70] sm:$0xff]  ;;  %v2141_v3 = vld [vmem:[%s2871_s2 + $0x78] sm:$0xff] }
 0x400   :  { %v810_v38 = vadd.f32 %v805_v35, %v685_v11  ;;  %v2145_v35 = vld [vmem:[%s2871_s2 + $0x98] sm:$0xff] }
 0x402   :  { %v813_v40 = vadd.f32 %v812_v26, %v810_v38  ;;  %v824_v34 = vmul.f32 %v810_v38, %v810_v38  ;;  %v969_v26 = vpop.permute.xlu1 %968 }
 0x404   :  { %v814_v5 = vrot.slane %v813_v40, 4  ;;  %v827_v41 = vadd.f32 %v826_v25, %v824_v34  ;;  %v974_v25 = vpop.permute.xlu2 %973 }
 0x406   :  { %v815_v42 = vadd.f32 %v814_v5, %v813_v40  ;;  %v828_v43 = vrot.slane %v827_v41, 4  ;;  %v2147_v5 = vld [vmem:[%s2871_s2 + $0xa8] sm:$0xff] }
 0x408   :  { %v816_v44 = vrot.slane %v815_v42, 2  ;;  %v829_v45 = vadd.f32 %v828_v43, %v827_v41  ;;  %v984_v41 = vpop.permute.xlu0 %983 }
 0x40a   :  { %v817_v47 = vadd.f32 %v816_v44, %v815_v42  ;;  %v830_v51 = vrot.slane %v829_v45, 2  ;;  %v964_v40 = vpop.permute.xlu1 %963 }
 0x40c   :  { %v818_v54 = vrot.slane %v817_v47, 1  ;;  %v831_v55 = vadd.f32 %v830_v51, %v829_v45  ;;  %v2776_v34 = vpop.permute.xlu2 %948 }
 0x40e   :  { %v819_v58 = vadd.f32 %v818_v54, %v817_v47  ;;  %v832_v59 = vrot.slane %v831_v55, 1 }
 0x410   :  { %v820_v60 = vmul.f32 %v819_v58, %v2641_v56  ;;  %v833_v62 = vadd.f32 %v832_v59, %v831_v55  ;;  %v959_v44 = vpop.permute.xlu0 %958 }
 0x412   :  { %v834_v63 = vmul.f32 %v833_v62, %v2641_v56  ;;  %v835_v0 = vmul.f32 %v820_v60, %v820_v60  ;;  %v840_v11 = vsub.f32 %v810_v38, %v820_v60  ;;  %v839_v12 = vsub.f32 %v809_v39, %v820_v60  ;;  %v2146_v38 = vld [vmem:[%s2871_s2 + $0xa0] sm:$0xff]  ;;  %v939_v42 = vpop.permute.xlu1 %938 }
 0x413   :  { %v837_v13 = vsub.f32 %v807_v31, %v820_v60  ;;  %v838_v16 = vsub.f32 %v808_v30, %v820_v60 }
 0x414   :  { %v836_v1 = vsub.f32 %v834_v63, %v835_v0  ;;  %v944_v43 = vpop.permute.xlu2 %943 }
 0x416   :  { %v841_v46 = vadd.f32 1e-05, %v836_v1 }
 0x418   :  { %2179 = vrsqrt.f32 %v841_v46  ;;  %vm848_vm10 = vweird.f32 %v841_v46  ;;  %v954_v54 = vpop.permute.xlu0 %953 }
 0x41a   :  { %v934_v45 = vpop.permute.xlu1 %933 }
 0x41c   :  { %v919_v47 = vpop.permute.xlu2 %918 }
 0x41e   :  { %v2180_v48 = vpop.eup %2179 }
 0x41f   :  { %v843_v50 = vmul.f32 %v2180_v48, %v841_v46  ;;  %vm849_vm9 = vweird.f32 %v2180_v48 }
 0x420   :  { %vm850_vm11 = vmor %vm848_vm10, %vm849_vm9  ;;  %v929_v46 = vpop.permute.xlu0 %928 }
 0x421   :  { %v844_v53 = vmul.f32 %v2180_v48, %v843_v50 }
 0x422   :  { %v909_v55 = vpop.permute.xlu1 %908 }
 0x423   :  { %v845_v57 = vmul.f32 0.5, %v844_v53 }
 0x424   :  { %v914_v59 = vpop.permute.xlu2 %913 }
 0x425   :  { %v846_v6 = vsub.f32 1.5, %v845_v57 }
 0x427   :  { %v847_v10 = vmul.f32 %v2180_v48, %v846_v6 }
 0x429   :  { %v851_v17 = vsel %vm850_vm11, %v2180_v48, %v847_v10  ;;  %v924_v48 = vpop.permute.xlu0 %923 }
 0x42a   :  { %v854_v7 = vmul.f32 %v851_v17, %v839_v12  ;;  %v855_v15 = vmul.f32 %v851_v17, %v840_v11  ;;  %v852_v14 = vmul.f32 %v851_v17, %v837_v13  ;;  %v853_v18 = vmul.f32 %v851_v17, %v838_v16 }
 0x42c   :  { %v878_v21 = vmul.f32 %v869_v2, %v854_v7  ;;  %v879_v22 = vmul.f32 %v874_v49, %v855_v15  ;;  %v876_v23 = vmul.f32 %v859_v4, %v852_v14  ;;  %v877_v24 = vmul.f32 %v864_v19, %v853_v18 }
 0x42e   :  { %v2736_v9 = vadd.f32 %v893_v52, %v878_v21  ;;  %v2738_v27 = vadd.f32 %v898_v61, %v879_v22  ;;  %v2742_v30 = vadd.f32 %v883_v28, %v876_v23  ;;  %v2744_v39 = vadd.f32 %v888_v29, %v877_v24 }
 0x430   :  { %v905_v31 = vpack.c.bf16 %v2738_v27, %v2736_v9  ;;  %v904_v8 = vpack.c.bf16 %v2744_v39, %v2742_v30 }
 0x432   :  { %1056 = vmatpush.bf16.msrb.mxu1 %v905_v31 }
 0x436   :  { %1057 = vmatpush.bf16.msrb.mxu1 %v904_v8 }
 0x439   :  { %2044 = vmatmul.msk.bf16.vlgmr.msrb.gmra.mxu1 %vm189_vm1, %v2140_v20 }
 0x449   :  { %2045 = vmatmul.msk.bf16.gmra.mxu1 %vm189_vm1, %v2141_v3 }
 0x459   :  { %2046 = vmatmul.msk.bf16.gmra.mxu1 %vm189_vm1, %v2142_v37 }
 0x469   :  { %2047 = vmatmul.msk.bf16.gmra.mxu1 %vm189_vm1, %v2143_v32 }
 0x479   :  { %2048 = vmatmul.msk.bf16.gmra.mxu1 %vm189_vm1, %v2144_v33 }
 0x489   :  { %2049 = vmatmul.msk.bf16.gmra.mxu1 %vm189_vm1, %v2145_v35 }
 0x499   :  { %2050 = vmatmul.msk.bf16.gmra.mxu1 %vm189_vm1, %v2146_v38 }
 0x4a9   :  { %2051 = vmatmul.msk.bf16.gmra.mxu1 %vm189_vm1, %v2147_v5 }
 0x4b6   :  { %v1059_v51 = vpop.f32.mrf.mxu1 }
 0x4b7   :  { %v1060_v58 = vadd.f32 %v1059_v51, %v909_v55 }
 0x4b9   :  { %v1099_v63 = vmax.f32 %v1060_v58, 0.0 }
 0x4be   :  { %v1061_v60 = vpop.f32.mrf.mxu1 }
 0x4bf   :  { %v1062_v62 = vadd.f32 %v1061_v60, %v914_v59 }
 0x4c1   :  { %v1100_v0 = vmax.f32 %v1062_v62, 0.0 }
 0x4c3   :  { %v1115_v1 = vpack.c.bf16 %v1100_v0, %v1099_v63  ;;  %v1131_v63 = vpop.permute.xlu1 %1130 }
 0x4c6   :  { %v1064_v2 = vpop.f32.mrf.mxu1 }
 0x4c7   :  { %v1065_v49 = vadd.f32 %v1064_v2, %v919_v47 }
 0x4c9   :  { %v1101_v53 = vmax.f32 %v1065_v49, 0.0 }
 0x4ce   :  { %v1066_v50 = vpop.f32.mrf.mxu1 }
 0x4cf   :  { %v1067_v52 = vadd.f32 %v1066_v50, %v924_v48 }
 0x4d1   :  { %v1102_v57 = vmax.f32 %v1067_v52, 0.0 }
 0x4d3   :  { %v1116_v61 = vpack.c.bf16 %v1102_v57, %v1101_v53 }
 0x4d6   :  { %v1069_v4 = vpop.f32.mrf.mxu1 }
 0x4d7   :  { %v1070_v6 = vadd.f32 %v1069_v4, %v929_v46  ;;  %v1136_v46 = vpop.permute.xlu2 %1135 }
 0x4d9   :  { %v1103_v12 = vmax.f32 %v1070_v6, 0.0 }
 0x4de   :  { %v1071_v10 = vpop.f32.mrf.mxu1 }
 0x4df   :  { %v1072_v11 = vadd.f32 %v1071_v10, %v934_v45 }
 0x4e1   :  { %v1104_v13 = vmax.f32 %v1072_v11, 0.0 }
 0x4e3   :  { %v1117_v16 = vpack.c.bf16 %v1104_v13, %v1103_v12 }
 0x4e6   :  { %v1074_v17 = vpop.f32.mrf.mxu1 }
 0x4e7   :  { %v1075_v7 = vadd.f32 %v1074_v17, %v939_v42 }
 0x4e9   :  { %v1105_v18 = vmax.f32 %v1075_v7, 0.0 }
 0x4ee   :  { %v1076_v15 = vpop.f32.mrf.mxu1 }
 0x4ef   :  { %v1077_v14 = vadd.f32 %v1076_v15, %v944_v43 }
 0x4f1   :  { %v1106_v19 = vmax.f32 %v1077_v14, 0.0 }
 0x4f3   :  { %v1118_v21 = vpack.c.bf16 %v1106_v19, %v1105_v18 }
 0x4f6   :  { %v1079_v22 = vpop.f32.mrf.mxu1 }
 0x4f7   :  { %v1080_v59 = vadd.f32 %v1079_v22, %v2776_v34  ;;  %v2149_v34 = vld [vmem:[%s2872_s3 + $0x18] sm:$0xff] }
 0x4fe   :  { %v1081_v23 = vpop.f32.mrf.mxu1 }
 0x4ff   :  { %v1082_v51 = vadd.f32 %v1081_v23, %v954_v54  ;;  %v1126_v54 = vpop.permute.xlu0 %1125 }
 0x506   :  { %v1084_v24 = vpop.f32.mrf.mxu1 }
 0x507   :  { %v1085_v45 = vadd.f32 %v1084_v24, %v959_v44  ;;  %v1141_v57 = vpop.permute.xlu0 %1140 }
 0x509   :  { %v1109_v60 = vmax.f32 %v1085_v45, 0.0 }
 0x50e   :  { %v1086_v28 = vpop.f32.mrf.mxu1 }
 0x50f   :  { %v1087_v5 = vadd.f32 %v1086_v28, %v964_v40  ;;  %v2148_v40 = vld [vmem:[%s2872_s3 + $0x10] sm:$0xff] }
 0x511   :  { %v1110_v55 = vmax.f32 %v1087_v5, 0.0  ;;  %v1260_v5 = vpop.permute.xlu0 %1259 }
 0x513   :  { %v1120_v62 = vpack.c.bf16 %v1110_v55, %v1109_v60 }
 0x516   :  { %v1089_v29 = vpop.f32.mrf.mxu1 }
 0x517   :  { %v1090_v33 = vadd.f32 %v1089_v29, %v969_v26 }
 0x519   :  { %v1111_v47 = vmax.f32 %v1090_v33, 0.0  ;;  %v1236_v33 = vpop.permute.xlu1 %1235 }
 0x51e   :  { %v1091_v31 = vpop.f32.mrf.mxu1 }
 0x51f   :  { %v1092_v37 = vadd.f32 %v1091_v31, %v974_v25  ;;  %v1107_v25 = vmax.f32 %v1080_v59, 0.0 }
 0x521   :  { %v1112_v42 = vmax.f32 %v1092_v37, 0.0 }
 0x523   :  { %v1121_v58 = vpack.c.bf16 %v1112_v42, %v1111_v47  ;;  %v1265_v47 = vpop.permute.xlu1 %1264 }
 0x526   :  { %v1094_v8 = vpop.f32.mrf.mxu1 }
 0x527   :  { %v1095_v20 = vadd.f32 %v1094_v8, %v979_v36  ;;  %v1108_v36 = vmax.f32 %v1082_v51, 0.0 }
 0x529   :  { %v1113_v35 = vmax.f32 %v1095_v20, 0.0  ;;  %v1119_v26 = vpack.c.bf16 %v1108_v36, %v1107_v25 }
 0x52e   :  { %v1096_v3 = vpop.f32.mrf.mxu1 }
 0x52f   :  { %v1097_v32 = vadd.f32 %v1096_v3, %v984_v41 }
 0x531   :  { %v1114_v38 = vmax.f32 %v1097_v32, 0.0  ;;  %v1241_v32 = vpop.permute.xlu2 %1240 }
 0x533   :  { %v1122_v43 = vpack.c.bf16 %v1114_v38, %v1113_v35 }
 0x535   :  { %1155 = vmatpush.bf16.msrb.mxu3 %v1122_v43 }
 0x539   :  { %1156 = vmatpush.bf16.msrb.mxu3 %v1121_v58  ;;  %v1226_v45 = vpop.permute.xlu2 %1225 }
 0x53d   :  { %1157 = vmatpush.bf16.msrb.mxu3 %v1120_v62 }
 0x541   :  { %1158 = vmatpush.bf16.msrb.mxu3 %v1119_v26 }
 0x545   :  { %1159 = vmatpush.bf16.msrb.mxu3 %v1118_v21 }
 0x549   :  { %1160 = vmatpush.bf16.msrb.mxu3 %v1117_v16 }
 0x54d   :  { %1161 = vmatpush.bf16.msrb.mxu3 %v1116_v61 }
 0x551   :  { %1162 = vmatpush.bf16.msrb.mxu3 %v1115_v1 }
 0x554   :  { %1163 = vmatmul.bf16.vlgmr.msrb.gmra.mxu3 %v2148_v40 }
 0x564   :  { %1168 = vmatmul.bf16.gmra.mxu3 %v2149_v34 }
 0x5d7   :  { %v1164_v41 = vpop.f32.mrf.mxu3 }
 0x5d8   :  { %v1165_v49 = vadd.f32 %v1164_v41, %v1126_v54  ;;  %v1231_v41 = vpop.permute.xlu0 %1230 }
 0x5da   :  { %v1174_v52 = vadd.f32 %v1165_v49, %v2742_v30  ;;  %v1255_v49 = vpop.permute.xlu2 %1254 }
 0x5dc   :  { %v1188_v4 = vmul.f32 %v1174_v52, %v1174_v52 }
 0x5df   :  { %v1166_v44 = vpop.f32.mrf.mxu3 }
 0x5e0   :  { %v1167_v0 = vadd.f32 %v1166_v44, %v1131_v63 }
 0x5e2   :  { %v1175_v50 = vadd.f32 %v1167_v0, %v2744_v39 }
 0x5e4   :  { %v1189_v53 = vmul.f32 %v1175_v50, %v1175_v50  ;;  %v1178_v6 = vadd.f32 %v1175_v50, %v1174_v52 }
 0x5e6   :  { %v1192_v12 = vadd.f32 %v1189_v53, %v1188_v4 }
 0x5e7   :  { %v1169_v2 = vpop.f32.mrf.mxu3 }
 0x5e8   :  { %v1170_v48 = vadd.f32 %v1169_v2, %v1136_v46 }
 0x5ea   :  { %v1176_v1 = vadd.f32 %v1170_v48, %v2736_v9  ;;  %v1250_v48 = vpop.permute.xlu1 %1249 }
 0x5ec   :  { %v1190_v10 = vmul.f32 %v1176_v1, %v1176_v1  ;;  %v1179_v13 = vadd.f32 %v1178_v6, %v1176_v1 }
 0x5ee   :  { %v1193_v17 = vadd.f32 %v1192_v12, %v1190_v10  ;;  %v1340_v10 = vpop.permute.xlu0 %1339 }
 0x5ef   :  { %v1171_v61 = vpop.f32.mrf.mxu3 }
 0x5f0   :  { %v1172_v11 = vadd.f32 %v1171_v61, %v1141_v57 }
 0x5f2   :  { %v1177_v16 = vadd.f32 %v1172_v11, %v2738_v27  ;;  %v1345_v11 = vpop.permute.xlu1 %1344 }
 0x5f4   :  { %v1180_v7 = vadd.f32 %v1179_v13, %v1177_v16  ;;  %v1191_v15 = vmul.f32 %v1177_v16, %v1177_v16  ;;  %v1350_v13 = vpop.permute.xlu2 %1349 }
 0x5f6   :  { %v1181_v14 = vrot.slane %v1180_v7, 4  ;;  %v1194_v39 = vadd.f32 %v1193_v17, %v1191_v15 }
 0x5f8   :  { %v1182_v18 = vadd.f32 %v1181_v14, %v1180_v7  ;;  %v1195_v30 = vrot.slane %v1194_v39, 4 }
 0x5fa   :  { %v1183_v19 = vrot.slane %v1182_v18, 2  ;;  %v1196_v9 = vadd.f32 %v1195_v30, %v1194_v39  ;;  %v1355_v30 = vpop.permute.xlu0 %1354 }
 0x5fc   :  { %v1184_v21 = vadd.f32 %v1183_v19, %v1182_v18  ;;  %v1197_v22 = vrot.slane %v1196_v9, 2 }
 0x5fe   :  { %v1185_v23 = vrot.slane %v1184_v21, 1  ;;  %v1198_v24 = vadd.f32 %v1197_v22, %v1196_v9 }
 0x600   :  { %v1186_v28 = vadd.f32 %v1185_v23, %v1184_v21  ;;  %v1199_v29 = vrot.slane %v1198_v24, 1 }
 0x602   :  { %v1187_v31 = vmul.f32 %v1186_v28, %v2641_v56  ;;  %v1200_v8 = vadd.f32 %v1199_v29, %v1198_v24 }
 0x604   :  { %v1201_v27 = vmul.f32 %v1200_v8, %v2641_v56  ;;  %v1202_v20 = vmul.f32 %v1187_v31, %v1187_v31  ;;  %v1207_v58 = vsub.f32 %v1177_v16, %v1187_v31  ;;  %v1206_v59 = vsub.f32 %v1176_v1, %v1187_v31  ;;  %v2151_v1 = vld [vmem:[%s2871_s2 + $0x28] sm:$0xff] }
 0x605   :  { %v1204_v60 = vsub.f32 %v1174_v52, %v1187_v31  ;;  %v1205_v36 = vsub.f32 %v1175_v50, %v1187_v31  ;;  %v2150_v50 = vld [vmem:[%s2871_s2 + $0x20] sm:$0xff] }
 0x606   :  { %v1203_v3 = vsub.f32 %v1201_v27, %v1202_v20 }
 0x608   :  { %v1208_v37 = vadd.f32 1e-05, %v1203_v3 }
 0x60a   :  { %2181 = vrsqrt.f32 %v1208_v37  ;;  %vm1215_vm13 = vweird.f32 %v1208_v37 }
 0x610   :  { %v2182_v35 = vpop.eup %2181 }
 0x611   :  { %v1210_v38 = vmul.f32 %v2182_v35, %v1208_v37  ;;  %vm1216_vm12 = vweird.f32 %v2182_v35 }
 0x612   :  { %vm1217_vm14 = vmor %vm1215_vm13, %vm1216_vm12 }
 0x613   :  { %v1211_v42 = vmul.f32 %v2182_v35, %v1210_v38 }
 0x615   :  { %v1212_v43 = vmul.f32 0.5, %v1211_v42 }
 0x617   :  { %v1213_v51 = vsub.f32 1.5, %v1212_v43 }
 0x619   :  { %v1214_v55 = vmul.f32 %v2182_v35, %v1213_v51 }
 0x61b   :  { %v1218_v62 = vsel %vm1217_vm14, %v2182_v35, %v1214_v55 }
 0x61c   :  { %v1222_v25 = vmul.f32 %v1218_v62, %v1207_v58  ;;  %v1221_v26 = vmul.f32 %v1218_v62, %v1206_v59  ;;  %v1219_v40 = vmul.f32 %v1218_v62, %v1204_v60  ;;  %v1220_v34 = vmul.f32 %v1218_v62, %v1205_v36  ;;  %v1459_v62 = vpop.permute.xlu2 %1458 }
 0x61e   :  { %v1246_v44 = vmul.f32 %v1241_v32, %v1222_v25  ;;  %v1245_v54 = vmul.f32 %v1236_v33, %v1221_v26  ;;  %v1243_v63 = vmul.f32 %v1226_v45, %v1219_v40  ;;  %v1244_v0 = vmul.f32 %v1231_v41, %v1220_v34  ;;  %v1454_v25 = vpop.permute.xlu1 %1453  ;;  %v1478_v34 = vpop.permute.xlu0 %1477 }
 0x620   :  { %v1269_v46 = vadd.f32 %v1260_v5, %v1245_v54  ;;  %v1270_v2 = vadd.f32 %v1265_v47, %v1246_v44  ;;  %v1267_v57 = vadd.f32 %v1250_v48, %v1243_v63  ;;  %v1268_v61 = vadd.f32 %v1255_v49, %v1244_v0 }
 0x622   :  { %v1336_v53 = vpack.c.bf16 %v1270_v2, %v1269_v46  ;;  %v1335_v52 = vpack.c.bf16 %v1268_v61, %v1267_v57 }
 0x624   :  { %1379 = vmatpush.bf16.msra.mxu0 %v1336_v53  ;;  %v1444_v54 = vpop.permute.xlu2 %1443 }
 0x626   :  { %v1483_v63 = vpop.permute.xlu1 %1482 }
 0x628   :  { %1380 = vmatpush.bf16.msra.mxu0 %v1335_v52 }
 0x62b   :  { %2068 = vmatmul.msk.bf16.vlgmr.msra.gmra.mxu0 %vm189_vm1, %v2150_v50 }
 0x63b   :  { %2069 = vmatmul.msk.bf16.gmra.mxu0 %vm189_vm1, %v2151_v1 }
 0x6a8   :  { %v1382_v4 = vpop.f32.mrf.mxu0 }
 0x6a9   :  { %v1383_v17 = vadd.f32 %v1382_v4, %v1340_v10  ;;  %v1449_v4 = vpop.permute.xlu0 %1448 }
 0x6ab   :  { %v1392_v14 = vadd.f32 %v1383_v17, %v1267_v57  ;;  %v1473_v17 = vpop.permute.xlu2 %1472 }
 0x6ad   :  { %v1406_v9 = vmul.f32 %v1392_v14, %v1392_v14 }
 0x6b0   :  { %v1384_v6 = vpop.f32.mrf.mxu0 }
 0x6b1   :  { %v1385_v12 = vadd.f32 %v1384_v6, %v1345_v11 }
 0x6b3   :  { %v1393_v15 = vadd.f32 %v1385_v12, %v1268_v61 }
 0x6b5   :  { %v1407_v18 = vmul.f32 %v1393_v15, %v1393_v15  ;;  %v1396_v21 = vadd.f32 %v1393_v15, %v1392_v14 }
 0x6b7   :  { %v1410_v24 = vadd.f32 %v1407_v18, %v1406_v9  ;;  %v2155_v9 = vld [vmem:[%s2871_s2 + $0xc8] sm:$0xff] }
 0x6b8   :  { %v1387_v16 = vpop.f32.mrf.mxu0 }
 0x6b9   :  { %v1388_v7 = vadd.f32 %v1387_v16, %v1350_v13 }
 0x6bb   :  { %v1394_v39 = vadd.f32 %v1388_v7, %v1269_v46  ;;  %v1468_v7 = vpop.permute.xlu1 %1467 }
 0x6bd   :  { %v1408_v22 = vmul.f32 %v1394_v39, %v1394_v39  ;;  %v1397_v28 = vadd.f32 %v1396_v21, %v1394_v39  ;;  %v2153_v21 = vld [vmem:[%s2871_s2 + $0xb8] sm:$0xff] }
 0x6bf   :  { %v1411_v31 = vadd.f32 %v1410_v24, %v1408_v22  ;;  %v2156_v22 = vld [vmem:[%s2871_s2 + $0xd0] sm:$0xff]  ;;  %v2158_v24 = vld [vmem:[%s2871_s2 + $0xe0] sm:$0xff] }
 0x6c0   :  { %v1389_v19 = vpop.f32.mrf.mxu0 }
 0x6c1   :  { %v1390_v23 = vadd.f32 %v1389_v19, %v1355_v30  ;;  %v2152_v30 = vld [vmem:[%s2871_s2 + $0xb0] sm:$0xff]  ;;  %v2154_v19 = vld [vmem:[%s2871_s2 + $0xc0] sm:$0xff] }
 0x6c3   :  { %v1395_v29 = vadd.f32 %v1390_v23, %v1270_v2  ;;  %v2157_v23 = vld [vmem:[%s2871_s2 + $0xd8] sm:$0xff] }
 0x6c5   :  { %v1398_v8 = vadd.f32 %v1397_v28, %v1395_v29  ;;  %v1409_v27 = vmul.f32 %v1395_v29, %v1395_v29  ;;  %v2159_v28 = vld [vmem:[%s2871_s2 + $0xe8] sm:$0xff] }
 0x6c7   :  { %v1399_v20 = vrot.slane %v1398_v8, 4  ;;  %v1412_v3 = vadd.f32 %v1411_v31, %v1409_v27  ;;  %v1554_v31 = vpop.permute.xlu2 %1553 }
 0x6c9   :  { %v1400_v37 = vadd.f32 %v1399_v20, %v1398_v8  ;;  %v1413_v32 = vrot.slane %v1412_v3, 4 }
 0x6cb   :  { %v1401_v33 = vrot.slane %v1400_v37, 2  ;;  %v1414_v35 = vadd.f32 %v1413_v32, %v1412_v3 }
 0x6cd   :  { %v1402_v38 = vadd.f32 %v1401_v33, %v1400_v37  ;;  %v1415_v5 = vrot.slane %v1414_v35, 2 }
 0x6cf   :  { %v1403_v42 = vrot.slane %v1402_v38, 1  ;;  %v1416_v43 = vadd.f32 %v1415_v5, %v1414_v35  ;;  %v1549_v27 = vpop.permute.xlu2 %1548 }
 0x6d1   :  { %v1404_v45 = vadd.f32 %v1403_v42, %v1402_v38  ;;  %v1417_v47 = vrot.slane %v1416_v43, 1 }
 0x6d3   :  { %v1405_v51 = vmul.f32 %v1404_v45, %v2641_v56  ;;  %v1418_v55 = vadd.f32 %v1417_v47, %v1416_v43 }
 0x6d5   :  { %v1419_v58 = vmul.f32 %v1418_v55, %v2641_v56  ;;  %v1420_v59 = vmul.f32 %v1405_v51, %v1405_v51  ;;  %v1425_v2 = vsub.f32 %v1395_v29, %v1405_v51  ;;  %v1424_v49 = vsub.f32 %v1394_v39, %v1405_v51  ;;  %v1564_v29 = vpop.permute.xlu0 %1563 }
 0x6d6   :  { %v1422_v48 = vsub.f32 %v1392_v14, %v1405_v51  ;;  %v1423_v53 = vsub.f32 %v1393_v15, %v1405_v51 }
 0x6d7   :  { %v1421_v60 = vsub.f32 %v1419_v58, %v1420_v59  ;;  %v1524_v37 = vpop.permute.xlu2 %1523  ;;  %v1569_v59 = vpop.permute.xlu1 %1568 }
 0x6d9   :  { %v1426_v36 = vadd.f32 1e-05, %v1421_v60 }
 0x6db   :  { %2183 = vrsqrt.f32 %v1426_v36  ;;  %vm1433_vm0 = vweird.f32 %v1426_v36 }
 0x6dd   :  { %v1559_v8 = vpop.permute.xlu0 %1558 }
 0x6e1   :  { %v2184_v26 = vpop.eup %2183 }
 0x6e2   :  { %v1428_v40 = vmul.f32 %v2184_v26, %v1426_v36  ;;  %vm1434_vm15 = vweird.f32 %v2184_v26 }
 0x6e3   :  { %vm1435_vm2 = vmor %vm1433_vm0, %vm1434_vm15 }
 0x6e4   :  { %v1429_v41 = vmul.f32 %v2184_v26, %v1428_v40 }
 0x6e5   :  { %v1534_v20 = vpop.permute.xlu0 %1533 }
 0x6e6   :  { %v1430_v44 = vmul.f32 0.5, %v1429_v41 }
 0x6e8   :  { %v1431_v0 = vsub.f32 1.5, %v1430_v44 }
 0x6ea   :  { %v1432_v46 = vmul.f32 %v2184_v26, %v1431_v0 }
 0x6ec   :  { %v1436_v57 = vsel %vm1435_vm2, %v2184_v26, %v1432_v46 }
 0x6ed   :  { %v1440_v61 = vmul.f32 %v1436_v57, %v1425_v2  ;;  %v1439_v52 = vmul.f32 %v1436_v57, %v1424_v49  ;;  %v1437_v50 = vmul.f32 %v1436_v57, %v1422_v48  ;;  %v1438_v1 = vmul.f32 %v1436_v57, %v1423_v53  ;;  %v1529_v33 = vpop.permute.xlu0 %1528 }
 0x6ef   :  { %v1464_v6 = vmul.f32 %v1459_v62, %v1440_v61  ;;  %v1463_v10 = vmul.f32 %v1454_v25, %v1439_v52  ;;  %v1461_v11 = vmul.f32 %v1444_v54, %v1437_v50  ;;  %v1462_v12 = vmul.f32 %v1449_v4, %v1438_v1  ;;  %v1544_v62 = vpop.permute.xlu1 %1543 }
 0x6f1   :  { %v2805_v13 = vadd.f32 %v1478_v34, %v1463_v10  ;;  %v2807_v16 = vadd.f32 %v1483_v63, %v1464_v6  ;;  %v2811_v15 = vadd.f32 %v1468_v7, %v1461_v11  ;;  %v2813_v39 = vadd.f32 %v1473_v17, %v1462_v12 }
 0x6f3   :  { %v1490_v14 = vpack.c.bf16 %v2807_v16, %v2805_v13  ;;  %v1489_v18 = vpack.c.bf16 %v2813_v39, %v2811_v15 }
 0x6f5   :  { %1641 = vmatpush.bf16.msrb.mxu0 %v1490_v14  ;;  %2164 = vmatpush.bf16.msra.mxu2 %v1490_v14  ;;  %v1504_v7 = vpop.permute.xlu0 %1503 }
 0x6f6   :  { %2165 = vmatpush.bf16.msra.mxu3 %v1490_v14 }
 0x6f7   :  { %v1539_v34 = vpop.permute.xlu1 %1538 }
 0x6f9   :  { %1642 = vmatpush.bf16.msrb.mxu0 %v1489_v18  ;;  %2166 = vmatpush.bf16.msra.mxu2 %v1489_v18 }
 0x6fa   :  { %2167 = vmatpush.bf16.msra.mxu3 %v1489_v18 }
 0x6fc   :  { %2102 = vmatmul.msk.bf16.vlgmr.msrb.gmra.mxu0 %vm189_vm1, %v2152_v30  ;;  %2104 = vmatmul.msk.bf16.vlgmr.msra.gmra.mxu2 %vm189_vm1, %v2154_v19  ;;  %v1519_v30 = vpop.permute.xlu2 %1518 }
 0x6fd   :  { %2105 = vmatmul.msk.bf16.vlgmr.msra.gmra.mxu3 %vm189_vm1, %v2155_v9 }
 0x6ff   :  { %v1514_v6 = vpop.permute.xlu1 %1513 }
 0x70c   :  { %2103 = vmatmul.msk.bf16.gmra.mxu0 %vm189_vm1, %v2153_v21 }
 0x70d   :  { %2106 = vmatmul.msk.bf16.gmra.mxu3 %vm189_vm1, %v2156_v22 }
 0x71d   :  { %2107 = vmatmul.msk.bf16.gmra.mxu3 %vm189_vm1, %v2157_v23  ;;  %v1509_v23 = vpop.permute.xlu1 %1508 }
 0x72d   :  { %2108 = vmatmul.msk.bf16.gmra.mxu3 %vm189_vm1, %v2158_v24 }
 0x73d   :  { %2109 = vmatmul.msk.bf16.gmra.mxu3 %vm189_vm1, %v2159_v28 }
 0x779   :  { %v1644_v36 = vpop.f32.mrf.mxu0 }
 0x77f   :  { %v1654_v2 = vpop.f32.mrf.mxu2 }
 0x780   :  { %v1659_v3 = vpop.f32.mrf.mxu3  ;;  %v1655_v22 = vadd.f32 %v1654_v2, %v1514_v6 }
 0x781   :  { %v1660_v32 = vadd.f32 %v1659_v3, %v1524_v37  ;;  %v1646_v26 = vpop.f32.mrf.mxu0  ;;  %v1494_v37 = vpop.permute.xlu2 %1493 }
 0x783   :  { %v1690_v5 = vmax.f32 %v1660_v32, 0.0  ;;  %v1645_v32 = vadd.f32 %v1644_v36, %v1494_v37 }
 0x787   :  { %v1656_v14 = vpop.f32.mrf.mxu2 }
 0x788   :  { %v1661_v35 = vpop.f32.mrf.mxu3  ;;  %v1657_v19 = vadd.f32 %v1656_v14, %v1519_v30 }
 0x789   :  { %v1662_v38 = vadd.f32 %v1661_v35, %v1529_v33  ;;  %v1649_v52 = vpop.f32.mrf.mxu0 }
 0x78a   :  { %v1689_v24 = vmax.f32 %v1657_v19, 0.0 }
 0x78b   :  { %v1691_v42 = vmax.f32 %v1662_v38, 0.0 }
 0x78d   :  { %v1703_v43 = vpack.c.bf16 %v1691_v42, %v1690_v5  ;;  %v1684_v5 = vmax.f32 %v1645_v32, 0.0 }
 0x790   :  { %v1664_v45 = vpop.f32.mrf.mxu3 }
 0x791   :  { %v1665_v10 = vadd.f32 %v1664_v45, %v1534_v20  ;;  %v1651_v21 = vpop.f32.mrf.mxu0  ;;  %v2160_v45 = vld [vmem:[%s2872_s3 + $0x20] sm:$0xff] }
 0x792   :  { %v1652_v28 = vadd.f32 %v1651_v21, %v1509_v23 }
 0x793   :  { %v1692_v18 = vmax.f32 %v1665_v10, 0.0 }
 0x794   :  { %v1687_v3 = vmax.f32 %v1652_v28, 0.0 }
 0x798   :  { %v1666_v47 = vpop.f32.mrf.mxu3 }
 0x799   :  { %v1667_v50 = vadd.f32 %v1666_v47, %v1539_v34 }
 0x79b   :  { %v1693_v12 = vmax.f32 %v1667_v50, 0.0 }
 0x79d   :  { %v1704_v9 = vpack.c.bf16 %v1693_v12, %v1692_v18 }
 0x7a0   :  { %v1669_v51 = vpop.f32.mrf.mxu3 }
 0x7a1   :  { %v1670_v57 = vadd.f32 %v1669_v51, %v1544_v62 }
 0x7a3   :  { %v1694_v11 = vmax.f32 %v1670_v57, 0.0 }
 0x7a8   :  { %v1671_v55 = vpop.f32.mrf.mxu3 }
 0x7a9   :  { %v1672_v49 = vadd.f32 %v1671_v55, %v1549_v27  ;;  %v1716_v55 = vpop.permute.xlu2 %1715 }
 0x7ab   :  { %v1695_v1 = vmax.f32 %v1672_v49, 0.0 }
 0x7ad   :  { %v1705_v17 = vpack.c.bf16 %v1695_v1, %v1694_v11 }
 0x7b0   :  { %v1674_v58 = vpop.f32.mrf.mxu3 }
 0x7b1   :  { %v1675_v63 = vadd.f32 %v1674_v58, %v1554_v31  ;;  %v1650_v31 = vadd.f32 %v1649_v52, %v1504_v7  ;;  %v1711_v58 = vpop.permute.xlu1 %1710  ;;  %v1821_v21 = vpop.permute.xlu2 %1820 }
 0x7b3   :  { %v1696_v61 = vmax.f32 %v1675_v63, 0.0  ;;  %v1686_v33 = vmax.f32 %v1650_v31, 0.0 }
 0x7b5   :  { %v1701_v38 = vpack.c.bf16 %v1687_v3, %v1686_v33 }
 0x7b8   :  { %v1676_v60 = vpop.f32.mrf.mxu3 }
 0x7b9   :  { %v1677_v44 = vadd.f32 %v1676_v60, %v1559_v8  ;;  %v1499_v8 = vpop.permute.xlu0 %1498 }
 0x7ba   :  { %v1647_v27 = vadd.f32 %v1646_v26, %v1499_v8  ;;  %v1850_v8 = vpop.permute.xlu2 %1849 }
 0x7bb   :  { %v1697_v48 = vmax.f32 %v1677_v44, 0.0  ;;  %v1726_v44 = vpop.permute.xlu1 %1725 }
 0x7bc   :  { %v1685_v35 = vmax.f32 %v1647_v27, 0.0 }
 0x7bd   :  { %v1706_v4 = vpack.c.bf16 %v1697_v48, %v1696_v61 }
 0x7be   :  { %v1700_v42 = vpack.c.bf16 %v1685_v35, %v1684_v5 }
 0x7c0   :  { %v1679_v25 = vpop.f32.mrf.mxu3 }
 0x7c1   :  { %v1680_v40 = vadd.f32 %v1679_v25, %v1564_v29  ;;  %v1688_v29 = vmax.f32 %v1655_v22, 0.0  ;;  %v1721_v60 = vpop.permute.xlu0 %1720 }
 0x7c3   :  { %v1698_v0 = vmax.f32 %v1680_v40, 0.0  ;;  %v1702_v20 = vpack.c.bf16 %v1689_v24, %v1688_v29  ;;  %v1845_v28 = vpop.permute.xlu1 %1844 }
 0x7c8   :  { %v1681_v41 = vpop.f32.mrf.mxu3 }
 0x7c9   :  { %v1682_v54 = vadd.f32 %v1681_v41, %v1569_v59  ;;  %v1826_v22 = vpop.permute.xlu0 %1825 }
 0x7cb   :  { %v1699_v46 = vmax.f32 %v1682_v54, 0.0 }
 0x7cd   :  { %v1707_v53 = vpack.c.bf16 %v1699_v46, %v1698_v0 }
 0x7cf   :  { %1740 = vmatpush.bf16.msra.mxu0 %v1707_v53 }
 0x7d1   :  { %v1811_v27 = vpop.permute.xlu0 %1810 }
 0x7d3   :  { %1741 = vmatpush.bf16.msra.mxu0 %v1706_v4 }
 0x7d7   :  { %1742 = vmatpush.bf16.msra.mxu0 %v1705_v17 }
 0x7db   :  { %1743 = vmatpush.bf16.msra.mxu0 %v1704_v9 }
 0x7df   :  { %1744 = vmatpush.bf16.msra.mxu0 %v1703_v43  ;;  %v2161_v43 = vld [vmem:[%s2872_s3 + $0x28] sm:$0xff] }
 0x7e3   :  { %1745 = vmatpush.bf16.msra.mxu0 %v1702_v20 }
 0x7e7   :  { %1746 = vmatpush.bf16.msra.mxu0 %v1701_v38 }
 0x7eb   :  { %1747 = vmatpush.bf16.msra.mxu0 %v1700_v42 }
 0x7ee   :  { %1748 = vmatmul.bf16.vlgmr.msra.gmra.mxu0 %v2160_v45 }
 0x7fe   :  { %1753 = vmatmul.bf16.gmra.mxu0 %v2161_v43  ;;  %v1816_v43 = vpop.permute.xlu1 %1815 }
 0x86b   :  { %v1749_v47 = vpop.f32.mrf.mxu0 }
 0x86c   :  { %v1750_v62 = vadd.f32 %v1749_v47, %v1711_v58 }
 0x86e   :  { %v1759_v40 = vadd.f32 %v1750_v62, %v2811_v15  ;;  %v1840_v62 = vpop.permute.xlu0 %1839 }
 0x870   :  { %v1773_v63 = vmul.f32 %v1759_v40, %v1759_v40 }
 0x873   :  { %v1751_v51 = vpop.f32.mrf.mxu0 }
 0x874   :  { %v1752_v59 = vadd.f32 %v1751_v51, %v1716_v55 }
 0x876   :  { %v1760_v26 = vadd.f32 %v1752_v59, %v2813_v39 }
 0x878   :  { %v1774_v41 = vmul.f32 %v1760_v26, %v1760_v26  ;;  %v1763_v0 = vadd.f32 %v1760_v26, %v1759_v40 }
 0x87a   :  { %v1777_v49 = vadd.f32 %v1774_v41, %v1773_v63 }
 0x87b   :  { %v1754_v36 = vpop.f32.mrf.mxu0 }
 0x87c   :  { %v1755_v25 = vadd.f32 %v1754_v36, %v1721_v60  ;;  %v1835_v36 = vpop.permute.xlu2 %1834 }
 0x87e   :  { %v1761_v34 = vadd.f32 %v1755_v25, %v2805_v13 }
 0x880   :  { %v1775_v46 = vmul.f32 %v1761_v34, %v1761_v34  ;;  %v1764_v48 = vadd.f32 %v1763_v0, %v1761_v34 }
 0x882   :  { %v1778_v57 = vadd.f32 %v1777_v49, %v1775_v46 }
 0x883   :  { %v1756_v54 = vpop.f32.mrf.mxu0 }
 0x884   :  { %v1757_v2 = vadd.f32 %v1756_v54, %v1726_v44  ;;  %v1868_v54 = vpop.permute.xlu1 %1867  ;;  %v1873_v0 = vpop.permute.xlu2 %1872 }
 0x886   :  { %v1762_v53 = vadd.f32 %v1757_v2, %v2807_v16 }
 0x888   :  { %v1765_v61 = vadd.f32 %v1764_v48, %v1762_v53  ;;  %v1776_v52 = vmul.f32 %v1762_v53, %v1762_v53 }
 0x88a   :  { %v1766_v50 = vrot.slane %v1765_v61, 4  ;;  %v1779_v39 = vadd.f32 %v1778_v57, %v1776_v52 }
 0x88c   :  { %v1767_v1 = vadd.f32 %v1766_v50, %v1765_v61  ;;  %v1780_v15 = vrot.slane %v1779_v39, 4  ;;  %v1907_v57 = vpop.permute.xlu1 %1906 }
 0x88e   :  { %v1768_v4 = vrot.slane %v1767_v1, 2  ;;  %v1781_v13 = vadd.f32 %v1780_v15, %v1779_v39 }
 0x890   :  { %v1769_v6 = vadd.f32 %v1768_v4, %v1767_v1  ;;  %v1782_v10 = vrot.slane %v1781_v13, 2 }
 0x892   :  { %v1770_v11 = vrot.slane %v1769_v6, 1  ;;  %v1783_v12 = vadd.f32 %v1782_v10, %v1781_v13  ;;  %v1921_v10 = vpop.permute.xlu2 %1920 }
 0x894   :  { %v1771_v17 = vadd.f32 %v1770_v11, %v1769_v6  ;;  %v1784_v7 = vrot.slane %v1783_v12, 1 }
 0x896   :  { %v1772_v14 = vmul.f32 %v1771_v17, %v2641_v56  ;;  %v1785_v18 = vadd.f32 %v1784_v7, %v1783_v12 }
 0x898   :  { %v1786_v16 = vmul.f32 %v1785_v18, %v2641_v56  ;;  %v1787_v30 = vmul.f32 %v1772_v14, %v1772_v14  ;;  %v1792_v37 = vsub.f32 %v1762_v53, %v1772_v14  ;;  %v1791_v56 = vsub.f32 %v1761_v34, %v1772_v14  ;;  %v1902_v53 = vpop.permute.xlu0 %1901 }
 0x899   :  { %v1789_v32 = vsub.f32 %v1759_v40, %v1772_v14  ;;  %v1790_v33 = vsub.f32 %v1760_v26, %v1772_v14  ;;  %v2162_v26 = vld [vmem:[%s2871_s2 + $0xf0] sm:$0xff] }
 0x89a   :  { %v1788_v19 = vsub.f32 %v1786_v16, %v1787_v30 }
 0x89c   :  { %v1793_v9 = vadd.f32 1e-05, %v1788_v19 }
 0x89e   :  { %2185 = vrsqrt.f32 %v1793_v9  ;;  %vm1800_vm4 = vweird.f32 %v1793_v9 }
 0x8a4   :  { %v2186_v23 = vpop.eup %2185 }
 0x8a5   :  { %v1795_v24 = vmul.f32 %v2186_v23, %v1793_v9  ;;  %vm1801_vm3 = vweird.f32 %v2186_v23 }
 0x8a6   :  { %vm1802_vm5 = vmor %vm1800_vm4, %vm1801_vm3 }
 0x8a7   :  { %v1796_v29 = vmul.f32 %v2186_v23, %v1795_v24 }
 0x8a9   :  { %v1797_v31 = vmul.f32 0.5, %v1796_v29 }
 0x8ab   :  { %v1798_v20 = vsub.f32 1.5, %v1797_v31 }
 0x8ad   :  { %v1799_v3 = vmul.f32 %v2186_v23, %v1798_v20 }
 0x8af   :  { %v1803_v35 = vsel %vm1802_vm5, %v2186_v23, %v1799_v3 }
 0x8b0   :  { %v1807_v38 = vmul.f32 %v1803_v35, %v1792_v37  ;;  %v1806_v5 = vmul.f32 %v1803_v35, %v1791_v56  ;;  %v1804_v42 = vmul.f32 %v1803_v35, %v1789_v32  ;;  %v1805_v45 = vmul.f32 %v1803_v35, %v1790_v33 }
 0x8b2   :  { %v1831_v47 = vmul.f32 %v1826_v22, %v1807_v38  ;;  %v1830_v51 = vmul.f32 %v1821_v21, %v1806_v5  ;;  %v1828_v55 = vmul.f32 %v1811_v27, %v1804_v42  ;;  %v1829_v58 = vmul.f32 %v1816_v43, %v1805_v45 }
 0x8b4   :  { %v1854_v59 = vadd.f32 %v1845_v28, %v1830_v51  ;;  %v1855_v60 = vadd.f32 %v1850_v8, %v1831_v47  ;;  %v1852_v41 = vadd.f32 %v1835_v36, %v1828_v55  ;;  %v1853_v44 = vadd.f32 %v1840_v62, %v1829_v58 }
 0x8b6   :  { %v1864_v25 = vpack.c.bf16 %v1855_v60, %v1854_v59  ;;  %v1863_v40 = vpack.c.bf16 %v1853_v44, %v1852_v41 }
 0x8b8   :  { %1889 = vmatpush.bf16.msrb.mxu0 %v1864_v25 }
 0x8bc   :  { %1890 = vmatpush.bf16.msrb.mxu0 %v1863_v40 }
 0x8bf   :  { %2122 = vmatmul.msk.bf16.vlgmr.msrb.gmra.mxu0 %vm189_vm1, %v2162_v26 }
 0x93c   :  { %v1892_v34 = vpop.f32.mrf.mxu0 }
 0x93d   :  { %v1893_v63 = vadd.f32 %v1892_v34, %v1868_v54 }
 0x93f   :  { %v1897_v2 = vmax.f32 %v1893_v63, 0.0 }
 0x941   :  { %v1909_v61 = vmul.f32 %v1902_v53, %v1897_v2 }
 0x944   :  { %v1894_v46 = vpop.f32.mrf.mxu0 }
 0x945   :  { %v1895_v49 = vadd.f32 %v1894_v46, %v1873_v0 }
 0x947   :  { %v1898_v48 = vmax.f32 %v1895_v49, 0.0 }
 0x949   :  { %v1910_v52 = vmul.f32 %v1907_v57, %v1898_v48 }
 0x94b   :  { %v1911_v50 = vadd.f32 %v1910_v52, %v1909_v61 }
 0x94d   :  { %v1912_v39 = vrot.slane %v1911_v50, 4 }
 0x94f   :  { %v1913_v1 = vadd.f32 %v1912_v39, %v1911_v50 }
 0x951   :  { %v1914_v15 = vrot.slane %v1913_v1, 2 }
 0x953   :  { %v1915_v4 = vadd.f32 %v1914_v15, %v1913_v1 }
 0x955   :  { %v1916_v13 = vrot.slane %v1915_v4, 1 }
 0x957   :  { %v1917_v6 = vadd.f32 %v1916_v13, %v1915_v4 }
 0x959   :  { %v1923_v11 = vadd.f32 %v1921_v10, %v1917_v6 }
 0x95b   :  { %v1924_v12 = vperm.slane %v1923_v11, 0 }
 0x95d   :  { %1925 = vst [vmem:[%s2873_s5] sm:$0xff] %v1924_v12 }

</bundles_post_ra>
